<compile_context>
chip_gen: v7x
topology: tpu7x:2x2x1
jax: 0.10.0
libtpu: 0.0.40
codegen_flags: <defaults>
</compile_context>

<pallas_src>
import jax
import jax.numpy as jnp
from jax import lax
from jax.experimental import pallas as pl
from jax.experimental.pallas import tpu as pltpu


def _round_up(x, m):
    return (x + m - 1) // m * m


def _padded_bytes(shape, dtype):
    """VMEM footprint of an array after (8, 128) tile padding of the minor dims."""
    shape = list(shape)
    if len(shape) == 1:
        shape = [1] + shape
    shape[-1] = _round_up(shape[-1], 128)
    shape[-2] = _round_up(shape[-2], 8)
    n = 1
    for s in shape:
        n *= s
    return n * jnp.dtype(dtype).itemsize


def lstm_tagger_kernel(ids_ref, emb_ref, wih_ref, whh_ref, b_ref,
                       wout_ref, bout_ref, out_ref,
                       x_scr, gx_scr, hall_scr):
    """Fused Embedding -> LSTM -> (inference) Dropout -> Linear.

    ids_ref:  SMEM (B, T) int32   token ids, batch-first as given by the caller
    emb_ref:  VMEM (V, 1, I)      embedding table (leading dim -> dynamic row fetch)
    wih_ref:  VMEM (I, 4*Hp)      W_ih^T, gates [i,f,g,o], each padded to Hp lanes
    whh_ref:  VMEM (Hp, 4*Hp)     W_hh^T, same gate padding (pad rows are zero)
    b_ref:    VMEM (1, 4*Hp)      b_ih + b_hh (f32, gate-padded with zeros)
    wout_ref: VMEM (Hp, Lp)       W_out^T (zero pad rows/cols)
    bout_ref: VMEM (1, Lp)        b_out (f32, zero padded)
    out_ref:  VMEM (Bp, T, Lp)    logits, batch-first, lane-dense
    x_scr:    VMEM (T*Bp, I)      gathered embeddings, time-major rows t*Bp + b
    gx_scr:   VMEM (T, Bp, 4*Hp)  input contribution to the gates (f32)
    hall_scr: VMEM (T, Bp, Hp)    all hidden states (f32)
    """
    B, T = ids_ref.shape
    Bp, _, Lp = out_ref.shape
    Hp, Hp4 = whh_ref.shape

    # (0) Fused embedding lookup: copy each token's row from the VMEM table into
    #     the time-major, batch-padded staging buffer.  B*T is tiny for this
    #     model; much larger sizes should move this under a grid axis.
    x_scr[...] = jnp.zeros_like(x_scr)            # keep padded batch rows inert
    for t in range(T):
        for bb in range(B):
            tok = ids_ref[bb, t]
            x_scr[pl.ds(t * Bp + bb, 1), :] = emb_ref[tok]

    # (1) Non-recurrent input projection + bias for ALL timesteps in a single
    #     MXU matmul (bias broadcast hoisted out of the recurrence).
    gx = (jnp.dot(x_scr[...], wih_ref[...], preferred_element_type=jnp.float32)
          + b_ref[...])
    gx_scr[...] = gx.reshape(T, Bp, Hp4)

    # (2) Serial recurrence: only h @ W_hh^T + the cell math stays on the
    #     critical path.  PyTorch gate order i, f, g, o; every gate slice is
    #     128-lane aligned.  Zero weight/bias padding + zero initial state keep
    #     the padded lanes exactly zero.
    def step(t, carry):
        h, c = carry
        gates = gx_scr[t] + jnp.dot(h.astype(whh_ref.dtype), whh_ref[...],
                                    preferred_element_type=jnp.float32)
        i_g = jax.nn.sigmoid(gates[:, 0 * Hp:1 * Hp])
        f_g = jax.nn.sigmoid(gates[:, 1 * Hp:2 * Hp])
        g_g = jnp.tanh(gates[:, 2 * Hp:3 * Hp])
        o_g = jax.nn.sigmoid(gates[:, 3 * Hp:4 * Hp])
        c_new = f_g * c + i_g * g_g
        h_new = o_g * jnp.tanh(c_new)
        hall_scr[t] = h_new
        return h_new, c_new

    h0 = jnp.zeros((Bp, Hp), jnp.float32)
    c0 = jnp.zeros((Bp, Hp), jnp.float32)
    lax.fori_loop(0, T, step, (h0, c0), unroll=min(T, 8))

    # (3) Dropout is identity at inference.  One batched output projection,
    #     then batch-first, lane-dense stores so the wrapper only slices.
    h_all = hall_scr[...].reshape(T * Bp, Hp).astype(wout_ref.dtype)
    logits = (jnp.dot(h_all, wout_ref[...], preferred_element_type=jnp.float32)
              + bout_ref[...])
    for t in range(T):
        out_ref[:, t, :] = logits[t * Bp:(t + 1) * Bp, :]


def prepare_params(params, compute_dtype=jnp.float32):
    """One-time repack of PyTorch-layout weights into the kernel layout.

    Call once after init / checkpoint load and close the result over the jitted
    forward; the per-call path is then a single pallas_call + one slice.
    compute_dtype=jnp.bfloat16 enables bf16 MXU operands (f32 accumulation) on
    v6e/v7x at a small accuracy cost; default f32 matches PyTorch exactly.
    """
    V, I = params["embedding"].shape
    H = params["w_hh"].shape[1]
    L = params["w_out"].shape[0]
    Hp = _round_up(H, 128)      # lane-aligned per-gate hidden width
    Lp = _round_up(L, 128)      # lane-dense output width

    def pad_gate_cols(w_t):     # (rows, 4H) -> (rows, 4Hp), gate order i,f,g,o
        r = w_t.shape[0]
        w = w_t.reshape(r, 4, H)
        w = jnp.pad(w, ((0, 0), (0, 0), (0, Hp - H)))
        return w.reshape(r, 4 * Hp)

    wih_t = pad_gate_cols(params["w_ih"].T).astype(compute_dtype)           # (I, 4Hp)
    whh_t = jnp.pad(pad_gate_cols(params["w_hh"].T),
                    ((0, Hp - H), (0, 0))).astype(compute_dtype)            # (Hp, 4Hp)
    b = (params["b_ih"] + params["b_hh"]).astype(jnp.float32).reshape(4, H)
    b = jnp.pad(b, ((0, 0), (0, Hp - H))).reshape(1, 4 * Hp)                # (1, 4Hp)
    wout_t = jnp.pad(params["w_out"].T,
                     ((0, Hp - H), (0, Lp - L))).astype(compute_dtype)      # (Hp, Lp)
    bout = jnp.pad(params["b_out"].astype(jnp.float32),
                   (0, Lp - L)).reshape(1, Lp)                              # (1, Lp)
    emb = params["embedding"].astype(compute_dtype).reshape(V, 1, I)        # (V, 1, I)

    return {"emb": emb, "w_ih_t": wih_t, "w_hh_t": whh_t, "b": b,
            "w_out_t": wout_t, "b_out": bout,
            "num_labels": int(L), "hidden": int(H)}


def pos_model_forward(sentence, prep):
    """sentence: (B, T) int32 token ids. Returns (B, T, num_labels) f32 logits.

    `prep` (from prepare_params) is expected to be closed over / static so that
    `num_labels` stays a Python int.
    """
    B, T = sentence.shape
    V, _, I = prep["emb"].shape
    Hp, Hp4 = prep["w_hh_t"].shape
    Lp = prep["w_out_t"].shape[1]
    L = prep["num_labels"]
    Bp = _round_up(B, 8)                         # sublane-aligned batch
    cdt = prep["emb"].dtype

    vmem = pltpu.MemorySpace.VMEM
    smem = pltpu.MemorySpace.SMEM

    footprint = sum([
        _padded_bytes((V, 1, I), cdt),
        _padded_bytes(prep["w_ih_t"].shape, cdt),
        _padded_bytes(prep["w_hh_t"].shape, cdt),
        _padded_bytes(prep["b"].shape, jnp.float32),
        _padded_bytes(prep["w_out_t"].shape, cdt),
        _padded_bytes(prep["b_out"].shape, jnp.float32),
        _padded_bytes((Bp, T, Lp), jnp.float32),
        _padded_bytes((T * Bp, I), cdt),
        _padded_bytes((T, Bp, Hp4), jnp.float32),
        _padded_bytes((T, Bp, Hp), jnp.float32),
    ])
    vmem_limit = int(min(64 * 2**20, max(16 * 2**20, 2 * footprint)))

    out = pl.pallas_call(
        lstm_tagger_kernel,
        out_shape=jax.ShapeDtypeStruct((Bp, T, Lp), jnp.float32),
        in_specs=[
            pl.BlockSpec(memory_space=smem),     # token ids
            pl.BlockSpec(memory_space=vmem),     # embedding table
            pl.BlockSpec(memory_space=vmem),     # W_ih^T
            pl.BlockSpec(memory_space=vmem),     # W_hh^T
            pl.BlockSpec(memory_space=vmem),     # fused LSTM bias
            pl.BlockSpec(memory_space=vmem),     # W_out^T
            pl.BlockSpec(memory_space=vmem),     # b_out
        ],
        out_specs=pl.BlockSpec(memory_space=vmem),
        scratch_shapes=[
            pltpu.VMEM((T * Bp, I), cdt),            # gathered embeddings
            pltpu.VMEM((T, Bp, Hp4), jnp.float32),   # gates_x for all steps
            pltpu.VMEM((T, Bp, Hp), jnp.float32),    # all hidden states
        ],
        compiler_params=pltpu.CompilerParams(vmem_limit_bytes=vmem_limit),
    )(sentence.astype(jnp.int32), prep["emb"], prep["w_ih_t"], prep["w_hh_t"],
      prep["b"], prep["w_out_t"], prep["b_out"])

    return out[:B, :, :L]                        # the only wrapper-side op


def pos_model_reference(sentence, params):
    """Pure-JAX reference (inference mode), mirrors PyTorch LSTM semantics."""
    emb = params["embedding"][sentence].astype(jnp.float32)      # (B, T, I)
    H = params["w_hh"].shape[1]
    w_ih, w_hh = params["w_ih"], params["w_hh"]
    bias = params["b_ih"] + params["b_hh"]

    def cell(carry, x_t):
        h, c = carry
        gates = x_t @ w_ih.T + h @ w_hh.T + bias
        i_g = jax.nn.sigmoid(gates[:, 0 * H:1 * H])
        f_g = jax.nn.sigmoid(gates[:, 1 * H:2 * H])
        g_g = jnp.tanh(gates[:, 2 * H:3 * H])
        o_g = jax.nn.sigmoid(gates[:, 3 * H:4 * H])
        c = f_g * c + i_g * g_g
        h = o_g * jnp.tanh(c)
        return (h, c), h

    B = emb.shape[0]
    h0 = jnp.zeros((B, H), jnp.float32)
    c0 = jnp.zeros((B, H), jnp.float32)
    _, hs = lax.scan(cell, (h0, c0), jnp.transpose(emb, (1, 0, 2)))
    hs = jnp.transpose(hs, (1, 0, 2))                            # (B, T, H)
    return hs @ params["w_out"].T + params["b_out"]


def init_params(key, num_words, num_labels, i_dim, o_dim):
    """Deterministic init mirroring PyTorch default inits."""
    ks = jax.random.split(key, 7)
    H = o_dim
    k_lstm = 1.0 / jnp.sqrt(H)
    k_lin = 1.0 / jnp.sqrt(H)
    return {
        "embedding": jax.random.normal(ks[0], (num_words, i_dim), jnp.float32),
        "w_ih": jax.random.uniform(ks[1], (4 * H, i_dim), jnp.float32, -k_lstm, k_lstm),
        "w_hh": jax.random.uniform(ks[2], (4 * H, H), jnp.float32, -k_lstm, k_lstm),
        "b_ih": jax.random.uniform(ks[3], (4 * H,), jnp.float32, -k_lstm, k_lstm),
        "b_hh": jax.random.uniform(ks[4], (4 * H,), jnp.float32, -k_lstm, k_lstm),
        "w_out": jax.random.uniform(ks[5], (num_labels, H), jnp.float32, -k_lin, k_lin),
        "b_out": jax.random.uniform(ks[6], (num_labels,), jnp.float32, -k_lin, k_lin),
    }


if __name__ == "__main__":
    num_words, num_labels, i_dim, o_dim = 50, 16, 32, 32
    B, T = 2, 8

    key = jax.random.PRNGKey(0)
    pkey, skey = jax.random.split(key)
    params = init_params(pkey, num_words, num_labels, i_dim, o_dim)
    sentence = jax.random.randint(skey, (B, T), 0, num_words, dtype=jnp.int32)

    prep = prepare_params(params)                    # one-time weight repacking
    fwd = jax.jit(lambda s: pos_model_forward(s, prep))

    logits = fwd(sentence)
    jax.block_until_ready(logits)
    assert logits.shape == (B, T, num_labels)

    ref = pos_model_reference(sentence, params)      # pure-JAX LSTM reference
    err = float(jnp.max(jnp.abs(logits - ref)))
    assert err < 5e-4, f"kernel/reference mismatch: max abs err = {err}"
    print("KERNEL_OK")
</pallas_src>

<mosaic_0001>
module attributes {stable_mosaic.version = 11 : i64} {
  func.func @lstm_tagger_kernel(%arg0: memref<2x8xi32, #tpu.memory_space<smem>>, %arg1: memref<50x1x32xf32, #tpu.memory_space<vmem>>, %arg2: memref<32x512xf32, #tpu.memory_space<vmem>>, %arg3: memref<128x512xf32, #tpu.memory_space<vmem>>, %arg4: memref<1x512xf32, #tpu.memory_space<vmem>>, %arg5: memref<128x128xf32, #tpu.memory_space<vmem>>, %arg6: memref<1x128xf32, #tpu.memory_space<vmem>>, %arg7: memref<8x8x128xf32, #tpu.memory_space<vmem>>, %arg8: memref<64x32xf32, #tpu.memory_space<vmem>>, %arg9: memref<8x8x512xf32, #tpu.memory_space<vmem>>, %arg10: memref<8x8x128xf32, #tpu.memory_space<vmem>>) attributes {dimension_semantics = [], scalar_prefetch = 0 : i64, scratch_operands = 3 : i64, tpu.core_type = #tpu.core_type<tc>} {
    %cst = arith.constant 0.000000e+00 : f32
    %0 = vector.broadcast %cst : f32 to vector<64x32xf32>
    %c0 = arith.constant 0 : index
    %c0_0 = arith.constant 0 : index
    %1 = vector.load %arg8[%c0, %c0_0] : memref<64x32xf32, #tpu.memory_space<vmem>>, vector<64x32xf32>
    tpu.vector_store %arg8[%c0, %c0_0], %0 {strides = array<i32>} : memref<64x32xf32, #tpu.memory_space<vmem>>, vector<64x32xf32>,
    %c0_1 = arith.constant 0 : index
    %c0_2 = arith.constant 0 : index
    %2 = memref.load %arg0[%c0_1, %c0_2] : memref<2x8xi32, #tpu.memory_space<smem>>
    %3 = arith.index_cast %2 : i32 to index
    %c0_3 = arith.constant 0 : index
    %c0_4 = arith.constant 0 : index
    %4 = vector.load %arg1[%3, %c0_3, %c0_4] : memref<50x1x32xf32, #tpu.memory_space<vmem>>, vector<1x1x32xf32>
    %5 = vector.shape_cast %4 : vector<1x1x32xf32> to vector<1x32xf32>
    %c0_5 = arith.constant 0 : index
    %c0_6 = arith.constant 0 : index
    %6 = vector.load %arg8[%c0_5, %c0_6] : memref<64x32xf32, #tpu.memory_space<vmem>>, vector<1x32xf32>
    tpu.vector_store %arg8[%c0_5, %c0_6], %5 {strides = array<i32>} : memref<64x32xf32, #tpu.memory_space<vmem>>, vector<1x32xf32>,
    %c1 = arith.constant 1 : index
    %c0_7 = arith.constant 0 : index
    %7 = memref.load %arg0[%c1, %c0_7] : memref<2x8xi32, #tpu.memory_space<smem>>
    %8 = arith.index_cast %7 : i32 to index
    %c0_8 = arith.constant 0 : index
    %c0_9 = arith.constant 0 : index
    %9 = vector.load %arg1[%8, %c0_8, %c0_9] : memref<50x1x32xf32, #tpu.memory_space<vmem>>, vector<1x1x32xf32>
    %10 = vector.shape_cast %9 : vector<1x1x32xf32> to vector<1x32xf32>
    %c1_10 = arith.constant 1 : index
    %c0_11 = arith.constant 0 : index
    %11 = vector.load %arg8[%c1_10, %c0_11] : memref<64x32xf32, #tpu.memory_space<vmem>>, vector<1x32xf32>
    tpu.vector_store %arg8[%c1_10, %c0_11], %10 {strides = array<i32>} : memref<64x32xf32, #tpu.memory_space<vmem>>, vector<1x32xf32>,
    %c0_12 = arith.constant 0 : index
    %c1_13 = arith.constant 1 : index
    %12 = memref.load %arg0[%c0_12, %c1_13] : memref<2x8xi32, #tpu.memory_space<smem>>
    %13 = arith.index_cast %12 : i32 to index
    %c0_14 = arith.constant 0 : index
    %c0_15 = arith.constant 0 : index
    %14 = vector.load %arg1[%13, %c0_14, %c0_15] : memref<50x1x32xf32, #tpu.memory_space<vmem>>, vector<1x1x32xf32>
    %15 = vector.shape_cast %14 : vector<1x1x32xf32> to vector<1x32xf32>
    %c8 = arith.constant 8 : index
    %c0_16 = arith.constant 0 : index
    %16 = vector.load %arg8[%c8, %c0_16] : memref<64x32xf32, #tpu.memory_space<vmem>>, vector<1x32xf32>
    tpu.vector_store %arg8[%c8, %c0_16], %15 {strides = array<i32>} : memref<64x32xf32, #tpu.memory_space<vmem>>, vector<1x32xf32>,
    %c1_17 = arith.constant 1 : index
    %c1_18 = arith.constant 1 : index
    %17 = memref.load %arg0[%c1_17, %c1_18] : memref<2x8xi32, #tpu.memory_space<smem>>
    %18 = arith.index_cast %17 : i32 to index
    %c0_19 = arith.constant 0 : index
    %c0_20 = arith.constant 0 : index
    %19 = vector.load %arg1[%18, %c0_19, %c0_20] : memref<50x1x32xf32, #tpu.memory_space<vmem>>, vector<1x1x32xf32>
    %20 = vector.shape_cast %19 : vector<1x1x32xf32> to vector<1x32xf32>
    %c9 = arith.constant 9 : index
    %c0_21 = arith.constant 0 : index
    %21 = vector.load %arg8[%c9, %c0_21] : memref<64x32xf32, #tpu.memory_space<vmem>>, vector<1x32xf32>
    tpu.vector_store %arg8[%c9, %c0_21], %20 {strides = array<i32>} : memref<64x32xf32, #tpu.memory_space<vmem>>, vector<1x32xf32>,
    %c0_22 = arith.constant 0 : index
    %c2 = arith.constant 2 : index
    %22 = memref.load %arg0[%c0_22, %c2] : memref<2x8xi32, #tpu.memory_space<smem>>
    %23 = arith.index_cast %22 : i32 to index
    %c0_23 = arith.constant 0 : index
    %c0_24 = arith.constant 0 : index
    %24 = vector.load %arg1[%23, %c0_23, %c0_24] : memref<50x1x32xf32, #tpu.memory_space<vmem>>, vector<1x1x32xf32>
    %25 = vector.shape_cast %24 : vector<1x1x32xf32> to vector<1x32xf32>
    %c16 = arith.constant 16 : index
    %c0_25 = arith.constant 0 : index
    %26 = vector.load %arg8[%c16, %c0_25] : memref<64x32xf32, #tpu.memory_space<vmem>>, vector<1x32xf32>
    tpu.vector_store %arg8[%c16, %c0_25], %25 {strides = array<i32>} : memref<64x32xf32, #tpu.memory_space<vmem>>, vector<1x32xf32>,
    %c1_26 = arith.constant 1 : index
    %c2_27 = arith.constant 2 : index
    %27 = memref.load %arg0[%c1_26, %c2_27] : memref<2x8xi32, #tpu.memory_space<smem>>
    %28 = arith.index_cast %27 : i32 to index
    %c0_28 = arith.constant 0 : index
    %c0_29 = arith.constant 0 : index
    %29 = vector.load %arg1[%28, %c0_28, %c0_29] : memref<50x1x32xf32, #tpu.memory_space<vmem>>, vector<1x1x32xf32>
    %30 = vector.shape_cast %29 : vector<1x1x32xf32> to vector<1x32xf32>
    %c17 = arith.constant 17 : index
    %c0_30 = arith.constant 0 : index
    %31 = vector.load %arg8[%c17, %c0_30] : memref<64x32xf32, #tpu.memory_space<vmem>>, vector<1x32xf32>
    tpu.vector_store %arg8[%c17, %c0_30], %30 {strides = array<i32>} : memref<64x32xf32, #tpu.memory_space<vmem>>, vector<1x32xf32>,
    %c0_31 = arith.constant 0 : index
    %c3 = arith.constant 3 : index
    %32 = memref.load %arg0[%c0_31, %c3] : memref<2x8xi32, #tpu.memory_space<smem>>
    %33 = arith.index_cast %32 : i32 to index
    %c0_32 = arith.constant 0 : index
    %c0_33 = arith.constant 0 : index
    %34 = vector.load %arg1[%33, %c0_32, %c0_33] : memref<50x1x32xf32, #tpu.memory_space<vmem>>, vector<1x1x32xf32>
    %35 = vector.shape_cast %34 : vector<1x1x32xf32> to vector<1x32xf32>
    %c24 = arith.constant 24 : index
    %c0_34 = arith.constant 0 : index
    %36 = vector.load %arg8[%c24, %c0_34] : memref<64x32xf32, #tpu.memory_space<vmem>>, vector<1x32xf32>
    tpu.vector_store %arg8[%c24, %c0_34], %35 {strides = array<i32>} : memref<64x32xf32, #tpu.memory_space<vmem>>, vector<1x32xf32>,
    %c1_35 = arith.constant 1 : index
    %c3_36 = arith.constant 3 : index
    %37 = memref.load %arg0[%c1_35, %c3_36] : memref<2x8xi32, #tpu.memory_space<smem>>
    %38 = arith.index_cast %37 : i32 to index
    %c0_37 = arith.constant 0 : index
    %c0_38 = arith.constant 0 : index
    %39 = vector.load %arg1[%38, %c0_37, %c0_38] : memref<50x1x32xf32, #tpu.memory_space<vmem>>, vector<1x1x32xf32>
    %40 = vector.shape_cast %39 : vector<1x1x32xf32> to vector<1x32xf32>
    %c25 = arith.constant 25 : index
    %c0_39 = arith.constant 0 : index
    %41 = vector.load %arg8[%c25, %c0_39] : memref<64x32xf32, #tpu.memory_space<vmem>>, vector<1x32xf32>
    tpu.vector_store %arg8[%c25, %c0_39], %40 {strides = array<i32>} : memref<64x32xf32, #tpu.memory_space<vmem>>, vector<1x32xf32>,
    %c0_40 = arith.constant 0 : index
    %c4 = arith.constant 4 : index
    %42 = memref.load %arg0[%c0_40, %c4] : memref<2x8xi32, #tpu.memory_space<smem>>
    %43 = arith.index_cast %42 : i32 to index
    %c0_41 = arith.constant 0 : index
    %c0_42 = arith.constant 0 : index
    %44 = vector.load %arg1[%43, %c0_41, %c0_42] : memref<50x1x32xf32, #tpu.memory_space<vmem>>, vector<1x1x32xf32>
    %45 = vector.shape_cast %44 : vector<1x1x32xf32> to vector<1x32xf32>
    %c32 = arith.constant 32 : index
    %c0_43 = arith.constant 0 : index
    %46 = vector.load %arg8[%c32, %c0_43] : memref<64x32xf32, #tpu.memory_space<vmem>>, vector<1x32xf32>
    tpu.vector_store %arg8[%c32, %c0_43], %45 {strides = array<i32>} : memref<64x32xf32, #tpu.memory_space<vmem>>, vector<1x32xf32>,
    %c1_44 = arith.constant 1 : index
    %c4_45 = arith.constant 4 : index
    %47 = memref.load %arg0[%c1_44, %c4_45] : memref<2x8xi32, #tpu.memory_space<smem>>
    %48 = arith.index_cast %47 : i32 to index
    %c0_46 = arith.constant 0 : index
    %c0_47 = arith.constant 0 : index
    %49 = vector.load %arg1[%48, %c0_46, %c0_47] : memref<50x1x32xf32, #tpu.memory_space<vmem>>, vector<1x1x32xf32>
    %50 = vector.shape_cast %49 : vector<1x1x32xf32> to vector<1x32xf32>
    %c33 = arith.constant 33 : index
    %c0_48 = arith.constant 0 : index
    %51 = vector.load %arg8[%c33, %c0_48] : memref<64x32xf32, #tpu.memory_space<vmem>>, vector<1x32xf32>
    tpu.vector_store %arg8[%c33, %c0_48], %50 {strides = array<i32>} : memref<64x32xf32, #tpu.memory_space<vmem>>, vector<1x32xf32>,
    %c0_49 = arith.constant 0 : index
    %c5 = arith.constant 5 : index
    %52 = memref.load %arg0[%c0_49, %c5] : memref<2x8xi32, #tpu.memory_space<smem>>
    %53 = arith.index_cast %52 : i32 to index
    %c0_50 = arith.constant 0 : index
    %c0_51 = arith.constant 0 : index
    %54 = vector.load %arg1[%53, %c0_50, %c0_51] : memref<50x1x32xf32, #tpu.memory_space<vmem>>, vector<1x1x32xf32>
    %55 = vector.shape_cast %54 : vector<1x1x32xf32> to vector<1x32xf32>
    %c40 = arith.constant 40 : index
    %c0_52 = arith.constant 0 : index
    %56 = vector.load %arg8[%c40, %c0_52] : memref<64x32xf32, #tpu.memory_space<vmem>>, vector<1x32xf32>
    tpu.vector_store %arg8[%c40, %c0_52], %55 {strides = array<i32>} : memref<64x32xf32, #tpu.memory_space<vmem>>, vector<1x32xf32>,
    %c1_53 = arith.constant 1 : index
    %c5_54 = arith.constant 5 : index
    %57 = memref.load %arg0[%c1_53, %c5_54] : memref<2x8xi32, #tpu.memory_space<smem>>
    %58 = arith.index_cast %57 : i32 to index
    %c0_55 = arith.constant 0 : index
    %c0_56 = arith.constant 0 : index
    %59 = vector.load %arg1[%58, %c0_55, %c0_56] : memref<50x1x32xf32, #tpu.memory_space<vmem>>, vector<1x1x32xf32>
    %60 = vector.shape_cast %59 : vector<1x1x32xf32> to vector<1x32xf32>
    %c41 = arith.constant 41 : index
    %c0_57 = arith.constant 0 : index
    %61 = vector.load %arg8[%c41, %c0_57] : memref<64x32xf32, #tpu.memory_space<vmem>>, vector<1x32xf32>
    tpu.vector_store %arg8[%c41, %c0_57], %60 {strides = array<i32>} : memref<64x32xf32, #tpu.memory_space<vmem>>, vector<1x32xf32>,
    %c0_58 = arith.constant 0 : index
    %c6 = arith.constant 6 : index
    %62 = memref.load %arg0[%c0_58, %c6] : memref<2x8xi32, #tpu.memory_space<smem>>
    %63 = arith.index_cast %62 : i32 to index
    %c0_59 = arith.constant 0 : index
    %c0_60 = arith.constant 0 : index
    %64 = vector.load %arg1[%63, %c0_59, %c0_60] : memref<50x1x32xf32, #tpu.memory_space<vmem>>, vector<1x1x32xf32>
    %65 = vector.shape_cast %64 : vector<1x1x32xf32> to vector<1x32xf32>
    %c48 = arith.constant 48 : index
    %c0_61 = arith.constant 0 : index
    %66 = vector.load %arg8[%c48, %c0_61] : memref<64x32xf32, #tpu.memory_space<vmem>>, vector<1x32xf32>
    tpu.vector_store %arg8[%c48, %c0_61], %65 {strides = array<i32>} : memref<64x32xf32, #tpu.memory_space<vmem>>, vector<1x32xf32>,
    %c1_62 = arith.constant 1 : index
    %c6_63 = arith.constant 6 : index
    %67 = memref.load %arg0[%c1_62, %c6_63] : memref<2x8xi32, #tpu.memory_space<smem>>
    %68 = arith.index_cast %67 : i32 to index
    %c0_64 = arith.constant 0 : index
    %c0_65 = arith.constant 0 : index
    %69 = vector.load %arg1[%68, %c0_64, %c0_65] : memref<50x1x32xf32, #tpu.memory_space<vmem>>, vector<1x1x32xf32>
    %70 = vector.shape_cast %69 : vector<1x1x32xf32> to vector<1x32xf32>
    %c49 = arith.constant 49 : index
    %c0_66 = arith.constant 0 : index
    %71 = vector.load %arg8[%c49, %c0_66] : memref<64x32xf32, #tpu.memory_space<vmem>>, vector<1x32xf32>
    tpu.vector_store %arg8[%c49, %c0_66], %70 {strides = array<i32>} : memref<64x32xf32, #tpu.memory_space<vmem>>, vector<1x32xf32>,
    %c0_67 = arith.constant 0 : index
    %c7 = arith.constant 7 : index
    %72 = memref.load %arg0[%c0_67, %c7] : memref<2x8xi32, #tpu.memory_space<smem>>
    %73 = arith.index_cast %72 : i32 to index
    %c0_68 = arith.constant 0 : index
    %c0_69 = arith.constant 0 : index
    %74 = vector.load %arg1[%73, %c0_68, %c0_69] : memref<50x1x32xf32, #tpu.memory_space<vmem>>, vector<1x1x32xf32>
    %75 = vector.shape_cast %74 : vector<1x1x32xf32> to vector<1x32xf32>
    %c56 = arith.constant 56 : index
    %c0_70 = arith.constant 0 : index
    %76 = vector.load %arg8[%c56, %c0_70] : memref<64x32xf32, #tpu.memory_space<vmem>>, vector<1x32xf32>
    tpu.vector_store %arg8[%c56, %c0_70], %75 {strides = array<i32>} : memref<64x32xf32, #tpu.memory_space<vmem>>, vector<1x32xf32>,
    %c1_71 = arith.constant 1 : index
    %c7_72 = arith.constant 7 : index
    %77 = memref.load %arg0[%c1_71, %c7_72] : memref<2x8xi32, #tpu.memory_space<smem>>
    %78 = arith.index_cast %77 : i32 to index
    %c0_73 = arith.constant 0 : index
    %c0_74 = arith.constant 0 : index
    %79 = vector.load %arg1[%78, %c0_73, %c0_74] : memref<50x1x32xf32, #tpu.memory_space<vmem>>, vector<1x1x32xf32>
    %80 = vector.shape_cast %79 : vector<1x1x32xf32> to vector<1x32xf32>
    %c57 = arith.constant 57 : index
    %c0_75 = arith.constant 0 : index
    %81 = vector.load %arg8[%c57, %c0_75] : memref<64x32xf32, #tpu.memory_space<vmem>>, vector<1x32xf32>
    tpu.vector_store %arg8[%c57, %c0_75], %80 {strides = array<i32>} : memref<64x32xf32, #tpu.memory_space<vmem>>, vector<1x32xf32>,
    %c0_76 = arith.constant 0 : index
    %c0_77 = arith.constant 0 : index
    %82 = vector.load %arg8[%c0_76, %c0_77] : memref<64x32xf32, #tpu.memory_space<vmem>>, vector<64x32xf32>
    %c0_78 = arith.constant 0 : index
    %c0_79 = arith.constant 0 : index
    %83 = vector.load %arg2[%c0_78, %c0_79] : memref<32x512xf32, #tpu.memory_space<vmem>>, vector<32x512xf32>
    %cst_80 = arith.constant dense<0.000000e+00> : vector<64x512xf32>
    %84 = tpu.matmul %82, %83, %cst_80 {dimension_numbers = #tpu.dot_dimension_numbers<[1], [0], [0], [1], [0, 0, 1, 1], [], []>} : vector<64x32xf32>, vector<32x512xf32>, vector<64x512xf32> -> vector<64x512xf32>
    %c0_81 = arith.constant 0 : index
    %c0_82 = arith.constant 0 : index
    %85 = vector.load %arg4[%c0_81, %c0_82] : memref<1x512xf32, #tpu.memory_space<vmem>>, vector<1x512xf32>
    %86 = vector.broadcast %85 : vector<1x512xf32> to vector<64x512xf32>
    %87 = arith.addf %84, %86 : vector<64x512xf32>
    %88 = vector.shape_cast %87 : vector<64x512xf32> to vector<8x8x512xf32>
    %c0_83 = arith.constant 0 : index
    %c0_84 = arith.constant 0 : index
    %c0_85 = arith.constant 0 : index
    %89 = vector.load %arg9[%c0_83, %c0_84, %c0_85] : memref<8x8x512xf32, #tpu.memory_space<vmem>>, vector<8x8x512xf32>
    tpu.vector_store %arg9[%c0_83, %c0_84, %c0_85], %88 {strides = array<i32>} : memref<8x8x512xf32, #tpu.memory_space<vmem>>, vector<8x8x512xf32>,
    %cst_86 = arith.constant 0.000000e+00 : f32
    %90 = vector.broadcast %cst_86 : f32 to vector<8x128xf32>
    %cst_87 = arith.constant 0.000000e+00 : f32
    %91 = vector.broadcast %cst_87 : f32 to vector<8x128xf32>
    %c0_i32 = arith.constant 0 : i32
    %92 = arith.index_cast %c0_i32 : i32 to index
    %c0_88 = arith.constant 0 : index
    %c0_89 = arith.constant 0 : index
    %93 = vector.load %arg9[%92, %c0_88, %c0_89] : memref<8x8x512xf32, #tpu.memory_space<vmem>>, vector<1x8x512xf32>
    %94 = vector.shape_cast %93 : vector<1x8x512xf32> to vector<8x512xf32>
    %c0_90 = arith.constant 0 : index
    %c0_91 = arith.constant 0 : index
    %95 = vector.load %arg3[%c0_90, %c0_91] : memref<128x512xf32, #tpu.memory_space<vmem>>, vector<128x512xf32>
    %cst_92 = arith.constant dense<0.000000e+00> : vector<8x512xf32>
    %96 = tpu.matmul %90, %95, %cst_92 {dimension_numbers = #tpu.dot_dimension_numbers<[1], [0], [0], [1], [0, 0, 1, 1], [], []>} : vector<8x128xf32>, vector<128x512xf32>, vector<8x512xf32> -> vector<8x512xf32>
    %97 = arith.addf %94, %96 : vector<8x512xf32>
    %98 = vector.extract_strided_slice %97 {offsets = [0, 0], sizes = [8, 128], strides = [1, 1]} : vector<8x512xf32> to vector<8x128xf32>
    %99 = arith.negf %98 : vector<8x128xf32>
    %100 = math.exp %99 : vector<8x128xf32>
    %cst_93 = arith.constant 1.000000e+00 : f32
    %101 = vector.broadcast %cst_93 : f32 to vector<8x128xf32>
    %102 = arith.addf %101, %100 : vector<8x128xf32>
    %103 = arith.divf %101, %102 : vector<8x128xf32>
    %104 = vector.extract_strided_slice %97 {offsets = [0, 128], sizes = [8, 128], strides = [1, 1]} : vector<8x512xf32> to vector<8x128xf32>
    %105 = arith.negf %104 : vector<8x128xf32>
    %106 = math.exp %105 : vector<8x128xf32>
    %cst_94 = arith.constant 1.000000e+00 : f32
    %107 = vector.broadcast %cst_94 : f32 to vector<8x128xf32>
    %108 = arith.addf %107, %106 : vector<8x128xf32>
    %109 = arith.divf %107, %108 : vector<8x128xf32>
    %110 = vector.extract_strided_slice %97 {offsets = [0, 256], sizes = [8, 128], strides = [1, 1]} : vector<8x512xf32> to vector<8x128xf32>
    %111 = math.tanh %110 : vector<8x128xf32>
    %112 = vector.extract_strided_slice %97 {offsets = [0, 384], sizes = [8, 128], strides = [1, 1]} : vector<8x512xf32> to vector<8x128xf32>
    %113 = arith.negf %112 : vector<8x128xf32>
    %114 = math.exp %113 : vector<8x128xf32>
    %cst_95 = arith.constant 1.000000e+00 : f32
    %115 = vector.broadcast %cst_95 : f32 to vector<8x128xf32>
    %116 = arith.addf %115, %114 : vector<8x128xf32>
    %117 = arith.divf %115, %116 : vector<8x128xf32>
    %118 = arith.mulf %109, %91 : vector<8x128xf32>
    %119 = arith.mulf %103, %111 : vector<8x128xf32>
    %120 = arith.addf %118, %119 : vector<8x128xf32>
    %121 = math.tanh %120 : vector<8x128xf32>
    %122 = arith.mulf %117, %121 : vector<8x128xf32>
    %123 = arith.index_cast %c0_i32 : i32 to index
    %c0_96 = arith.constant 0 : index
    %c0_97 = arith.constant 0 : index
    %124 = vector.load %arg10[%123, %c0_96, %c0_97] : memref<8x8x128xf32, #tpu.memory_space<vmem>>, vector<1x8x128xf32>
    %125 = vector.shape_cast %124 : vector<1x8x128xf32> to vector<8x128xf32>
    %126 = vector.shape_cast %122 : vector<8x128xf32> to vector<1x8x128xf32>
    tpu.vector_store %arg10[%123, %c0_96, %c0_97], %126 {strides = array<i32>} : memref<8x8x128xf32, #tpu.memory_space<vmem>>, vector<1x8x128xf32>,
    %c1_i32 = arith.constant 1 : i32
    %127 = arith.index_cast %c1_i32 : i32 to index
    %c0_98 = arith.constant 0 : index
    %c0_99 = arith.constant 0 : index
    %128 = vector.load %arg9[%127, %c0_98, %c0_99] : memref<8x8x512xf32, #tpu.memory_space<vmem>>, vector<1x8x512xf32>
    %129 = vector.shape_cast %128 : vector<1x8x512xf32> to vector<8x512xf32>
    %c0_100 = arith.constant 0 : index
    %c0_101 = arith.constant 0 : index
    %130 = vector.load %arg3[%c0_100, %c0_101] : memref<128x512xf32, #tpu.memory_space<vmem>>, vector<128x512xf32>
    %cst_102 = arith.constant dense<0.000000e+00> : vector<8x512xf32>
    %131 = tpu.matmul %122, %130, %cst_102 {dimension_numbers = #tpu.dot_dimension_numbers<[1], [0], [0], [1], [0, 0, 1, 1], [], []>} : vector<8x128xf32>, vector<128x512xf32>, vector<8x512xf32> -> vector<8x512xf32>
    %132 = arith.addf %129, %131 : vector<8x512xf32>
    %133 = vector.extract_strided_slice %132 {offsets = [0, 0], sizes = [8, 128], strides = [1, 1]} : vector<8x512xf32> to vector<8x128xf32>
    %134 = arith.negf %133 : vector<8x128xf32>
    %135 = math.exp %134 : vector<8x128xf32>
    %cst_103 = arith.constant 1.000000e+00 : f32
    %136 = vector.broadcast %cst_103 : f32 to vector<8x128xf32>
    %137 = arith.addf %136, %135 : vector<8x128xf32>
    %138 = arith.divf %136, %137 : vector<8x128xf32>
    %139 = vector.extract_strided_slice %132 {offsets = [0, 128], sizes = [8, 128], strides = [1, 1]} : vector<8x512xf32> to vector<8x128xf32>
    %140 = arith.negf %139 : vector<8x128xf32>
    %141 = math.exp %140 : vector<8x128xf32>
    %cst_104 = arith.constant 1.000000e+00 : f32
    %142 = vector.broadcast %cst_104 : f32 to vector<8x128xf32>
    %143 = arith.addf %142, %141 : vector<8x128xf32>
    %144 = arith.divf %142, %143 : vector<8x128xf32>
    %145 = vector.extract_strided_slice %132 {offsets = [0, 256], sizes = [8, 128], strides = [1, 1]} : vector<8x512xf32> to vector<8x128xf32>
    %146 = math.tanh %145 : vector<8x128xf32>
    %147 = vector.extract_strided_slice %132 {offsets = [0, 384], sizes = [8, 128], strides = [1, 1]} : vector<8x512xf32> to vector<8x128xf32>
    %148 = arith.negf %147 : vector<8x128xf32>
    %149 = math.exp %148 : vector<8x128xf32>
    %cst_105 = arith.constant 1.000000e+00 : f32
    %150 = vector.broadcast %cst_105 : f32 to vector<8x128xf32>
    %151 = arith.addf %150, %149 : vector<8x128xf32>
    %152 = arith.divf %150, %151 : vector<8x128xf32>
    %153 = arith.mulf %144, %120 : vector<8x128xf32>
    %154 = arith.mulf %138, %146 : vector<8x128xf32>
    %155 = arith.addf %153, %154 : vector<8x128xf32>
    %156 = math.tanh %155 : vector<8x128xf32>
    %157 = arith.mulf %152, %156 : vector<8x128xf32>
    %158 = arith.index_cast %c1_i32 : i32 to index
    %c0_106 = arith.constant 0 : index
    %c0_107 = arith.constant 0 : index
    %159 = vector.load %arg10[%158, %c0_106, %c0_107] : memref<8x8x128xf32, #tpu.memory_space<vmem>>, vector<1x8x128xf32>
    %160 = vector.shape_cast %159 : vector<1x8x128xf32> to vector<8x128xf32>
    %161 = vector.shape_cast %157 : vector<8x128xf32> to vector<1x8x128xf32>
    tpu.vector_store %arg10[%158, %c0_106, %c0_107], %161 {strides = array<i32>} : memref<8x8x128xf32, #tpu.memory_space<vmem>>, vector<1x8x128xf32>,
    %c2_i32 = arith.constant 2 : i32
    %162 = arith.index_cast %c2_i32 : i32 to index
    %c0_108 = arith.constant 0 : index
    %c0_109 = arith.constant 0 : index
    %163 = vector.load %arg9[%162, %c0_108, %c0_109] : memref<8x8x512xf32, #tpu.memory_space<vmem>>, vector<1x8x512xf32>
    %164 = vector.shape_cast %163 : vector<1x8x512xf32> to vector<8x512xf32>
    %c0_110 = arith.constant 0 : index
    %c0_111 = arith.constant 0 : index
    %165 = vector.load %arg3[%c0_110, %c0_111] : memref<128x512xf32, #tpu.memory_space<vmem>>, vector<128x512xf32>
    %cst_112 = arith.constant dense<0.000000e+00> : vector<8x512xf32>
    %166 = tpu.matmul %157, %165, %cst_112 {dimension_numbers = #tpu.dot_dimension_numbers<[1], [0], [0], [1], [0, 0, 1, 1], [], []>} : vector<8x128xf32>, vector<128x512xf32>, vector<8x512xf32> -> vector<8x512xf32>
    %167 = arith.addf %164, %166 : vector<8x512xf32>
    %168 = vector.extract_strided_slice %167 {offsets = [0, 0], sizes = [8, 128], strides = [1, 1]} : vector<8x512xf32> to vector<8x128xf32>
    %169 = arith.negf %168 : vector<8x128xf32>
    %170 = math.exp %169 : vector<8x128xf32>
    %cst_113 = arith.constant 1.000000e+00 : f32
    %171 = vector.broadcast %cst_113 : f32 to vector<8x128xf32>
    %172 = arith.addf %171, %170 : vector<8x128xf32>
    %173 = arith.divf %171, %172 : vector<8x128xf32>
    %174 = vector.extract_strided_slice %167 {offsets = [0, 128], sizes = [8, 128], strides = [1, 1]} : vector<8x512xf32> to vector<8x128xf32>
    %175 = arith.negf %174 : vector<8x128xf32>
    %176 = math.exp %175 : vector<8x128xf32>
    %cst_114 = arith.constant 1.000000e+00 : f32
    %177 = vector.broadcast %cst_114 : f32 to vector<8x128xf32>
    %178 = arith.addf %177, %176 : vector<8x128xf32>
    %179 = arith.divf %177, %178 : vector<8x128xf32>
    %180 = vector.extract_strided_slice %167 {offsets = [0, 256], sizes = [8, 128], strides = [1, 1]} : vector<8x512xf32> to vector<8x128xf32>
    %181 = math.tanh %180 : vector<8x128xf32>
    %182 = vector.extract_strided_slice %167 {offsets = [0, 384], sizes = [8, 128], strides = [1, 1]} : vector<8x512xf32> to vector<8x128xf32>
    %183 = arith.negf %182 : vector<8x128xf32>
    %184 = math.exp %183 : vector<8x128xf32>
    %cst_115 = arith.constant 1.000000e+00 : f32
    %185 = vector.broadcast %cst_115 : f32 to vector<8x128xf32>
    %186 = arith.addf %185, %184 : vector<8x128xf32>
    %187 = arith.divf %185, %186 : vector<8x128xf32>
    %188 = arith.mulf %179, %155 : vector<8x128xf32>
    %189 = arith.mulf %173, %181 : vector<8x128xf32>
    %190 = arith.addf %188, %189 : vector<8x128xf32>
    %191 = math.tanh %190 : vector<8x128xf32>
    %192 = arith.mulf %187, %191 : vector<8x128xf32>
    %193 = arith.index_cast %c2_i32 : i32 to index
    %c0_116 = arith.constant 0 : index
    %c0_117 = arith.constant 0 : index
    %194 = vector.load %arg10[%193, %c0_116, %c0_117] : memref<8x8x128xf32, #tpu.memory_space<vmem>>, vector<1x8x128xf32>
    %195 = vector.shape_cast %194 : vector<1x8x128xf32> to vector<8x128xf32>
    %196 = vector.shape_cast %192 : vector<8x128xf32> to vector<1x8x128xf32>
    tpu.vector_store %arg10[%193, %c0_116, %c0_117], %196 {strides = array<i32>} : memref<8x8x128xf32, #tpu.memory_space<vmem>>, vector<1x8x128xf32>,
    %c3_i32 = arith.constant 3 : i32
    %197 = arith.index_cast %c3_i32 : i32 to index
    %c0_118 = arith.constant 0 : index
    %c0_119 = arith.constant 0 : index
    %198 = vector.load %arg9[%197, %c0_118, %c0_119] : memref<8x8x512xf32, #tpu.memory_space<vmem>>, vector<1x8x512xf32>
    %199 = vector.shape_cast %198 : vector<1x8x512xf32> to vector<8x512xf32>
    %c0_120 = arith.constant 0 : index
    %c0_121 = arith.constant 0 : index
    %200 = vector.load %arg3[%c0_120, %c0_121] : memref<128x512xf32, #tpu.memory_space<vmem>>, vector<128x512xf32>
    %cst_122 = arith.constant dense<0.000000e+00> : vector<8x512xf32>
    %201 = tpu.matmul %192, %200, %cst_122 {dimension_numbers = #tpu.dot_dimension_numbers<[1], [0], [0], [1], [0, 0, 1, 1], [], []>} : vector<8x128xf32>, vector<128x512xf32>, vector<8x512xf32> -> vector<8x512xf32>
    %202 = arith.addf %199, %201 : vector<8x512xf32>
    %203 = vector.extract_strided_slice %202 {offsets = [0, 0], sizes = [8, 128], strides = [1, 1]} : vector<8x512xf32> to vector<8x128xf32>
    %204 = arith.negf %203 : vector<8x128xf32>
    %205 = math.exp %204 : vector<8x128xf32>
    %cst_123 = arith.constant 1.000000e+00 : f32
    %206 = vector.broadcast %cst_123 : f32 to vector<8x128xf32>
    %207 = arith.addf %206, %205 : vector<8x128xf32>
    %208 = arith.divf %206, %207 : vector<8x128xf32>
    %209 = vector.extract_strided_slice %202 {offsets = [0, 128], sizes = [8, 128], strides = [1, 1]} : vector<8x512xf32> to vector<8x128xf32>
    %210 = arith.negf %209 : vector<8x128xf32>
    %211 = math.exp %210 : vector<8x128xf32>
    %cst_124 = arith.constant 1.000000e+00 : f32
    %212 = vector.broadcast %cst_124 : f32 to vector<8x128xf32>
    %213 = arith.addf %212, %211 : vector<8x128xf32>
    %214 = arith.divf %212, %213 : vector<8x128xf32>
    %215 = vector.extract_strided_slice %202 {offsets = [0, 256], sizes = [8, 128], strides = [1, 1]} : vector<8x512xf32> to vector<8x128xf32>
    %216 = math.tanh %215 : vector<8x128xf32>
    %217 = vector.extract_strided_slice %202 {offsets = [0, 384], sizes = [8, 128], strides = [1, 1]} : vector<8x512xf32> to vector<8x128xf32>
    %218 = arith.negf %217 : vector<8x128xf32>
    %219 = math.exp %218 : vector<8x128xf32>
    %cst_125 = arith.constant 1.000000e+00 : f32
    %220 = vector.broadcast %cst_125 : f32 to vector<8x128xf32>
    %221 = arith.addf %220, %219 : vector<8x128xf32>
    %222 = arith.divf %220, %221 : vector<8x128xf32>
    %223 = arith.mulf %214, %190 : vector<8x128xf32>
    %224 = arith.mulf %208, %216 : vector<8x128xf32>
    %225 = arith.addf %223, %224 : vector<8x128xf32>
    %226 = math.tanh %225 : vector<8x128xf32>
    %227 = arith.mulf %222, %226 : vector<8x128xf32>
    %228 = arith.index_cast %c3_i32 : i32 to index
    %c0_126 = arith.constant 0 : index
    %c0_127 = arith.constant 0 : index
    %229 = vector.load %arg10[%228, %c0_126, %c0_127] : memref<8x8x128xf32, #tpu.memory_space<vmem>>, vector<1x8x128xf32>
    %230 = vector.shape_cast %229 : vector<1x8x128xf32> to vector<8x128xf32>
    %231 = vector.shape_cast %227 : vector<8x128xf32> to vector<1x8x128xf32>
    tpu.vector_store %arg10[%228, %c0_126, %c0_127], %231 {strides = array<i32>} : memref<8x8x128xf32, #tpu.memory_space<vmem>>, vector<1x8x128xf32>,
    %c4_i32 = arith.constant 4 : i32
    %232 = arith.index_cast %c4_i32 : i32 to index
    %c0_128 = arith.constant 0 : index
    %c0_129 = arith.constant 0 : index
    %233 = vector.load %arg9[%232, %c0_128, %c0_129] : memref<8x8x512xf32, #tpu.memory_space<vmem>>, vector<1x8x512xf32>
    %234 = vector.shape_cast %233 : vector<1x8x512xf32> to vector<8x512xf32>
    %c0_130 = arith.constant 0 : index
    %c0_131 = arith.constant 0 : index
    %235 = vector.load %arg3[%c0_130, %c0_131] : memref<128x512xf32, #tpu.memory_space<vmem>>, vector<128x512xf32>
    %cst_132 = arith.constant dense<0.000000e+00> : vector<8x512xf32>
    %236 = tpu.matmul %227, %235, %cst_132 {dimension_numbers = #tpu.dot_dimension_numbers<[1], [0], [0], [1], [0, 0, 1, 1], [], []>} : vector<8x128xf32>, vector<128x512xf32>, vector<8x512xf32> -> vector<8x512xf32>
    %237 = arith.addf %234, %236 : vector<8x512xf32>
    %238 = vector.extract_strided_slice %237 {offsets = [0, 0], sizes = [8, 128], strides = [1, 1]} : vector<8x512xf32> to vector<8x128xf32>
    %239 = arith.negf %238 : vector<8x128xf32>
    %240 = math.exp %239 : vector<8x128xf32>
    %cst_133 = arith.constant 1.000000e+00 : f32
    %241 = vector.broadcast %cst_133 : f32 to vector<8x128xf32>
    %242 = arith.addf %241, %240 : vector<8x128xf32>
    %243 = arith.divf %241, %242 : vector<8x128xf32>
    %244 = vector.extract_strided_slice %237 {offsets = [0, 128], sizes = [8, 128], strides = [1, 1]} : vector<8x512xf32> to vector<8x128xf32>
    %245 = arith.negf %244 : vector<8x128xf32>
    %246 = math.exp %245 : vector<8x128xf32>
    %cst_134 = arith.constant 1.000000e+00 : f32
    %247 = vector.broadcast %cst_134 : f32 to vector<8x128xf32>
    %248 = arith.addf %247, %246 : vector<8x128xf32>
    %249 = arith.divf %247, %248 : vector<8x128xf32>
    %250 = vector.extract_strided_slice %237 {offsets = [0, 256], sizes = [8, 128], strides = [1, 1]} : vector<8x512xf32> to vector<8x128xf32>
    %251 = math.tanh %250 : vector<8x128xf32>
    %252 = vector.extract_strided_slice %237 {offsets = [0, 384], sizes = [8, 128], strides = [1, 1]} : vector<8x512xf32> to vector<8x128xf32>
    %253 = arith.negf %252 : vector<8x128xf32>
    %254 = math.exp %253 : vector<8x128xf32>
    %cst_135 = arith.constant 1.000000e+00 : f32
    %255 = vector.broadcast %cst_135 : f32 to vector<8x128xf32>
    %256 = arith.addf %255, %254 : vector<8x128xf32>
    %257 = arith.divf %255, %256 : vector<8x128xf32>
    %258 = arith.mulf %249, %225 : vector<8x128xf32>
    %259 = arith.mulf %243, %251 : vector<8x128xf32>
    %260 = arith.addf %258, %259 : vector<8x128xf32>
    %261 = math.tanh %260 : vector<8x128xf32>
    %262 = arith.mulf %257, %261 : vector<8x128xf32>
    %263 = arith.index_cast %c4_i32 : i32 to index
    %c0_136 = arith.constant 0 : index
    %c0_137 = arith.constant 0 : index
    %264 = vector.load %arg10[%263, %c0_136, %c0_137] : memref<8x8x128xf32, #tpu.memory_space<vmem>>, vector<1x8x128xf32>
    %265 = vector.shape_cast %264 : vector<1x8x128xf32> to vector<8x128xf32>
    %266 = vector.shape_cast %262 : vector<8x128xf32> to vector<1x8x128xf32>
    tpu.vector_store %arg10[%263, %c0_136, %c0_137], %266 {strides = array<i32>} : memref<8x8x128xf32, #tpu.memory_space<vmem>>, vector<1x8x128xf32>,
    %c5_i32 = arith.constant 5 : i32
    %267 = arith.index_cast %c5_i32 : i32 to index
    %c0_138 = arith.constant 0 : index
    %c0_139 = arith.constant 0 : index
    %268 = vector.load %arg9[%267, %c0_138, %c0_139] : memref<8x8x512xf32, #tpu.memory_space<vmem>>, vector<1x8x512xf32>
    %269 = vector.shape_cast %268 : vector<1x8x512xf32> to vector<8x512xf32>
    %c0_140 = arith.constant 0 : index
    %c0_141 = arith.constant 0 : index
    %270 = vector.load %arg3[%c0_140, %c0_141] : memref<128x512xf32, #tpu.memory_space<vmem>>, vector<128x512xf32>
    %cst_142 = arith.constant dense<0.000000e+00> : vector<8x512xf32>
    %271 = tpu.matmul %262, %270, %cst_142 {dimension_numbers = #tpu.dot_dimension_numbers<[1], [0], [0], [1], [0, 0, 1, 1], [], []>} : vector<8x128xf32>, vector<128x512xf32>, vector<8x512xf32> -> vector<8x512xf32>
    %272 = arith.addf %269, %271 : vector<8x512xf32>
    %273 = vector.extract_strided_slice %272 {offsets = [0, 0], sizes = [8, 128], strides = [1, 1]} : vector<8x512xf32> to vector<8x128xf32>
    %274 = arith.negf %273 : vector<8x128xf32>
    %275 = math.exp %274 : vector<8x128xf32>
    %cst_143 = arith.constant 1.000000e+00 : f32
    %276 = vector.broadcast %cst_143 : f32 to vector<8x128xf32>
    %277 = arith.addf %276, %275 : vector<8x128xf32>
    %278 = arith.divf %276, %277 : vector<8x128xf32>
    %279 = vector.extract_strided_slice %272 {offsets = [0, 128], sizes = [8, 128], strides = [1, 1]} : vector<8x512xf32> to vector<8x128xf32>
    %280 = arith.negf %279 : vector<8x128xf32>
    %281 = math.exp %280 : vector<8x128xf32>
    %cst_144 = arith.constant 1.000000e+00 : f32
    %282 = vector.broadcast %cst_144 : f32 to vector<8x128xf32>
    %283 = arith.addf %282, %281 : vector<8x128xf32>
    %284 = arith.divf %282, %283 : vector<8x128xf32>
    %285 = vector.extract_strided_slice %272 {offsets = [0, 256], sizes = [8, 128], strides = [1, 1]} : vector<8x512xf32> to vector<8x128xf32>
    %286 = math.tanh %285 : vector<8x128xf32>
    %287 = vector.extract_strided_slice %272 {offsets = [0, 384], sizes = [8, 128], strides = [1, 1]} : vector<8x512xf32> to vector<8x128xf32>
    %288 = arith.negf %287 : vector<8x128xf32>
    %289 = math.exp %288 : vector<8x128xf32>
    %cst_145 = arith.constant 1.000000e+00 : f32
    %290 = vector.broadcast %cst_145 : f32 to vector<8x128xf32>
    %291 = arith.addf %290, %289 : vector<8x128xf32>
    %292 = arith.divf %290, %291 : vector<8x128xf32>
    %293 = arith.mulf %284, %260 : vector<8x128xf32>
    %294 = arith.mulf %278, %286 : vector<8x128xf32>
    %295 = arith.addf %293, %294 : vector<8x128xf32>
    %296 = math.tanh %295 : vector<8x128xf32>
    %297 = arith.mulf %292, %296 : vector<8x128xf32>
    %298 = arith.index_cast %c5_i32 : i32 to index
    %c0_146 = arith.constant 0 : index
    %c0_147 = arith.constant 0 : index
    %299 = vector.load %arg10[%298, %c0_146, %c0_147] : memref<8x8x128xf32, #tpu.memory_space<vmem>>, vector<1x8x128xf32>
    %300 = vector.shape_cast %299 : vector<1x8x128xf32> to vector<8x128xf32>
    %301 = vector.shape_cast %297 : vector<8x128xf32> to vector<1x8x128xf32>
    tpu.vector_store %arg10[%298, %c0_146, %c0_147], %301 {strides = array<i32>} : memref<8x8x128xf32, #tpu.memory_space<vmem>>, vector<1x8x128xf32>,
    %c6_i32 = arith.constant 6 : i32
    %302 = arith.index_cast %c6_i32 : i32 to index
    %c0_148 = arith.constant 0 : index
    %c0_149 = arith.constant 0 : index
    %303 = vector.load %arg9[%302, %c0_148, %c0_149] : memref<8x8x512xf32, #tpu.memory_space<vmem>>, vector<1x8x512xf32>
    %304 = vector.shape_cast %303 : vector<1x8x512xf32> to vector<8x512xf32>
    %c0_150 = arith.constant 0 : index
    %c0_151 = arith.constant 0 : index
    %305 = vector.load %arg3[%c0_150, %c0_151] : memref<128x512xf32, #tpu.memory_space<vmem>>, vector<128x512xf32>
    %cst_152 = arith.constant dense<0.000000e+00> : vector<8x512xf32>
    %306 = tpu.matmul %297, %305, %cst_152 {dimension_numbers = #tpu.dot_dimension_numbers<[1], [0], [0], [1], [0, 0, 1, 1], [], []>} : vector<8x128xf32>, vector<128x512xf32>, vector<8x512xf32> -> vector<8x512xf32>
    %307 = arith.addf %304, %306 : vector<8x512xf32>
    %308 = vector.extract_strided_slice %307 {offsets = [0, 0], sizes = [8, 128], strides = [1, 1]} : vector<8x512xf32> to vector<8x128xf32>
    %309 = arith.negf %308 : vector<8x128xf32>
    %310 = math.exp %309 : vector<8x128xf32>
    %cst_153 = arith.constant 1.000000e+00 : f32
    %311 = vector.broadcast %cst_153 : f32 to vector<8x128xf32>
    %312 = arith.addf %311, %310 : vector<8x128xf32>
    %313 = arith.divf %311, %312 : vector<8x128xf32>
    %314 = vector.extract_strided_slice %307 {offsets = [0, 128], sizes = [8, 128], strides = [1, 1]} : vector<8x512xf32> to vector<8x128xf32>
    %315 = arith.negf %314 : vector<8x128xf32>
    %316 = math.exp %315 : vector<8x128xf32>
    %cst_154 = arith.constant 1.000000e+00 : f32
    %317 = vector.broadcast %cst_154 : f32 to vector<8x128xf32>
    %318 = arith.addf %317, %316 : vector<8x128xf32>
    %319 = arith.divf %317, %318 : vector<8x128xf32>
    %320 = vector.extract_strided_slice %307 {offsets = [0, 256], sizes = [8, 128], strides = [1, 1]} : vector<8x512xf32> to vector<8x128xf32>
    %321 = math.tanh %320 : vector<8x128xf32>
    %322 = vector.extract_strided_slice %307 {offsets = [0, 384], sizes = [8, 128], strides = [1, 1]} : vector<8x512xf32> to vector<8x128xf32>
    %323 = arith.negf %322 : vector<8x128xf32>
    %324 = math.exp %323 : vector<8x128xf32>
    %cst_155 = arith.constant 1.000000e+00 : f32
    %325 = vector.broadcast %cst_155 : f32 to vector<8x128xf32>
    %326 = arith.addf %325, %324 : vector<8x128xf32>
    %327 = arith.divf %325, %326 : vector<8x128xf32>
    %328 = arith.mulf %319, %295 : vector<8x128xf32>
    %329 = arith.mulf %313, %321 : vector<8x128xf32>
    %330 = arith.addf %328, %329 : vector<8x128xf32>
    %331 = math.tanh %330 : vector<8x128xf32>
    %332 = arith.mulf %327, %331 : vector<8x128xf32>
    %333 = arith.index_cast %c6_i32 : i32 to index
    %c0_156 = arith.constant 0 : index
    %c0_157 = arith.constant 0 : index
    %334 = vector.load %arg10[%333, %c0_156, %c0_157] : memref<8x8x128xf32, #tpu.memory_space<vmem>>, vector<1x8x128xf32>
    %335 = vector.shape_cast %334 : vector<1x8x128xf32> to vector<8x128xf32>
    %336 = vector.shape_cast %332 : vector<8x128xf32> to vector<1x8x128xf32>
    tpu.vector_store %arg10[%333, %c0_156, %c0_157], %336 {strides = array<i32>} : memref<8x8x128xf32, #tpu.memory_space<vmem>>, vector<1x8x128xf32>,
    %c7_i32 = arith.constant 7 : i32
    %337 = arith.index_cast %c7_i32 : i32 to index
    %c0_158 = arith.constant 0 : index
    %c0_159 = arith.constant 0 : index
    %338 = vector.load %arg9[%337, %c0_158, %c0_159] : memref<8x8x512xf32, #tpu.memory_space<vmem>>, vector<1x8x512xf32>
    %339 = vector.shape_cast %338 : vector<1x8x512xf32> to vector<8x512xf32>
    %c0_160 = arith.constant 0 : index
    %c0_161 = arith.constant 0 : index
    %340 = vector.load %arg3[%c0_160, %c0_161] : memref<128x512xf32, #tpu.memory_space<vmem>>, vector<128x512xf32>
    %cst_162 = arith.constant dense<0.000000e+00> : vector<8x512xf32>
    %341 = tpu.matmul %332, %340, %cst_162 {dimension_numbers = #tpu.dot_dimension_numbers<[1], [0], [0], [1], [0, 0, 1, 1], [], []>} : vector<8x128xf32>, vector<128x512xf32>, vector<8x512xf32> -> vector<8x512xf32>
    %342 = arith.addf %339, %341 : vector<8x512xf32>
    %343 = vector.extract_strided_slice %342 {offsets = [0, 0], sizes = [8, 128], strides = [1, 1]} : vector<8x512xf32> to vector<8x128xf32>
    %344 = arith.negf %343 : vector<8x128xf32>
    %345 = math.exp %344 : vector<8x128xf32>
    %cst_163 = arith.constant 1.000000e+00 : f32
    %346 = vector.broadcast %cst_163 : f32 to vector<8x128xf32>
    %347 = arith.addf %346, %345 : vector<8x128xf32>
    %348 = arith.divf %346, %347 : vector<8x128xf32>
    %349 = vector.extract_strided_slice %342 {offsets = [0, 128], sizes = [8, 128], strides = [1, 1]} : vector<8x512xf32> to vector<8x128xf32>
    %350 = arith.negf %349 : vector<8x128xf32>
    %351 = math.exp %350 : vector<8x128xf32>
    %cst_164 = arith.constant 1.000000e+00 : f32
    %352 = vector.broadcast %cst_164 : f32 to vector<8x128xf32>
    %353 = arith.addf %352, %351 : vector<8x128xf32>
    %354 = arith.divf %352, %353 : vector<8x128xf32>
    %355 = vector.extract_strided_slice %342 {offsets = [0, 256], sizes = [8, 128], strides = [1, 1]} : vector<8x512xf32> to vector<8x128xf32>
    %356 = math.tanh %355 : vector<8x128xf32>
    %357 = vector.extract_strided_slice %342 {offsets = [0, 384], sizes = [8, 128], strides = [1, 1]} : vector<8x512xf32> to vector<8x128xf32>
    %358 = arith.negf %357 : vector<8x128xf32>
    %359 = math.exp %358 : vector<8x128xf32>
    %cst_165 = arith.constant 1.000000e+00 : f32
    %360 = vector.broadcast %cst_165 : f32 to vector<8x128xf32>
    %361 = arith.addf %360, %359 : vector<8x128xf32>
    %362 = arith.divf %360, %361 : vector<8x128xf32>
    %363 = arith.mulf %354, %330 : vector<8x128xf32>
    %364 = arith.mulf %348, %356 : vector<8x128xf32>
    %365 = arith.addf %363, %364 : vector<8x128xf32>
    %366 = math.tanh %365 : vector<8x128xf32>
    %367 = arith.mulf %362, %366 : vector<8x128xf32>
    %368 = arith.index_cast %c7_i32 : i32 to index
    %c0_166 = arith.constant 0 : index
    %c0_167 = arith.constant 0 : index
    %369 = vector.load %arg10[%368, %c0_166, %c0_167] : memref<8x8x128xf32, #tpu.memory_space<vmem>>, vector<1x8x128xf32>
    %370 = vector.shape_cast %369 : vector<1x8x128xf32> to vector<8x128xf32>
    %371 = vector.shape_cast %367 : vector<8x128xf32> to vector<1x8x128xf32>
    tpu.vector_store %arg10[%368, %c0_166, %c0_167], %371 {strides = array<i32>} : memref<8x8x128xf32, #tpu.memory_space<vmem>>, vector<1x8x128xf32>,
    %c8_i32 = arith.constant 8 : i32
    %c0_168 = arith.constant 0 : index
    %c0_169 = arith.constant 0 : index
    %c0_170 = arith.constant 0 : index
    %372 = vector.load %arg10[%c0_168, %c0_169, %c0_170] : memref<8x8x128xf32, #tpu.memory_space<vmem>>, vector<8x8x128xf32>
    %373 = vector.shape_cast %372 : vector<8x8x128xf32> to vector<64x128xf32>
    %c0_171 = arith.constant 0 : index
    %c0_172 = arith.constant 0 : index
    %374 = vector.load %arg5[%c0_171, %c0_172] : memref<128x128xf32, #tpu.memory_space<vmem>>, vector<128x128xf32>
    %cst_173 = arith.constant dense<0.000000e+00> : vector<64x128xf32>
    %375 = tpu.matmul %373, %374, %cst_173 {dimension_numbers = #tpu.dot_dimension_numbers<[1], [0], [0], [1], [0, 0, 1, 1], [], []>} : vector<64x128xf32>, vector<128x128xf32>, vector<64x128xf32> -> vector<64x128xf32>
    %c0_174 = arith.constant 0 : index
    %c0_175 = arith.constant 0 : index
    %376 = vector.load %arg6[%c0_174, %c0_175] : memref<1x128xf32, #tpu.memory_space<vmem>>, vector<1x128xf32>
    %377 = vector.broadcast %376 : vector<1x128xf32> to vector<64x128xf32>
    %378 = arith.addf %375, %377 : vector<64x128xf32>
    %379 = vector.extract_strided_slice %378 {offsets = [0, 0], sizes = [8, 128], strides = [1, 1]} : vector<64x128xf32> to vector<8x128xf32>
    %c0_176 = arith.constant 0 : index
    %c0_177 = arith.constant 0 : index
    %c0_178 = arith.constant 0 : index
    %380 = vector.load %arg7[%c0_176, %c0_177, %c0_178] : memref<8x8x128xf32, #tpu.memory_space<vmem>>, vector<8x1x128xf32>
    %381 = vector.shape_cast %380 : vector<8x1x128xf32> to vector<8x128xf32>
    %382 = vector.shape_cast %379 : vector<8x128xf32> to vector<8x1x128xf32>
    tpu.vector_store %arg7[%c0_176, %c0_177, %c0_178], %382 {strides = array<i32>} : memref<8x8x128xf32, #tpu.memory_space<vmem>>, vector<8x1x128xf32>,
    %383 = vector.extract_strided_slice %378 {offsets = [8, 0], sizes = [8, 128], strides = [1, 1]} : vector<64x128xf32> to vector<8x128xf32>
    %c0_179 = arith.constant 0 : index
    %c1_180 = arith.constant 1 : index
    %c0_181 = arith.constant 0 : index
    %384 = vector.load %arg7[%c0_179, %c1_180, %c0_181] : memref<8x8x128xf32, #tpu.memory_space<vmem>>, vector<8x1x128xf32>
    %385 = vector.shape_cast %384 : vector<8x1x128xf32> to vector<8x128xf32>
    %386 = vector.shape_cast %383 : vector<8x128xf32> to vector<8x1x128xf32>
    tpu.vector_store %arg7[%c0_179, %c1_180, %c0_181], %386 {strides = array<i32>} : memref<8x8x128xf32, #tpu.memory_space<vmem>>, vector<8x1x128xf32>,
    %387 = vector.extract_strided_slice %378 {offsets = [16, 0], sizes = [8, 128], strides = [1, 1]} : vector<64x128xf32> to vector<8x128xf32>
    %c0_182 = arith.constant 0 : index
    %c2_183 = arith.constant 2 : index
    %c0_184 = arith.constant 0 : index
    %388 = vector.load %arg7[%c0_182, %c2_183, %c0_184] : memref<8x8x128xf32, #tpu.memory_space<vmem>>, vector<8x1x128xf32>
    %389 = vector.shape_cast %388 : vector<8x1x128xf32> to vector<8x128xf32>
    %390 = vector.shape_cast %387 : vector<8x128xf32> to vector<8x1x128xf32>
    tpu.vector_store %arg7[%c0_182, %c2_183, %c0_184], %390 {strides = array<i32>} : memref<8x8x128xf32, #tpu.memory_space<vmem>>, vector<8x1x128xf32>,
    %391 = vector.extract_strided_slice %378 {offsets = [24, 0], sizes = [8, 128], strides = [1, 1]} : vector<64x128xf32> to vector<8x128xf32>
    %c0_185 = arith.constant 0 : index
    %c3_186 = arith.constant 3 : index
    %c0_187 = arith.constant 0 : index
    %392 = vector.load %arg7[%c0_185, %c3_186, %c0_187] : memref<8x8x128xf32, #tpu.memory_space<vmem>>, vector<8x1x128xf32>
    %393 = vector.shape_cast %392 : vector<8x1x128xf32> to vector<8x128xf32>
    %394 = vector.shape_cast %391 : vector<8x128xf32> to vector<8x1x128xf32>
    tpu.vector_store %arg7[%c0_185, %c3_186, %c0_187], %394 {strides = array<i32>} : memref<8x8x128xf32, #tpu.memory_space<vmem>>, vector<8x1x128xf32>,
    %395 = vector.extract_strided_slice %378 {offsets = [32, 0], sizes = [8, 128], strides = [1, 1]} : vector<64x128xf32> to vector<8x128xf32>
    %c0_188 = arith.constant 0 : index
    %c4_189 = arith.constant 4 : index
    %c0_190 = arith.constant 0 : index
    %396 = vector.load %arg7[%c0_188, %c4_189, %c0_190] : memref<8x8x128xf32, #tpu.memory_space<vmem>>, vector<8x1x128xf32>
    %397 = vector.shape_cast %396 : vector<8x1x128xf32> to vector<8x128xf32>
    %398 = vector.shape_cast %395 : vector<8x128xf32> to vector<8x1x128xf32>
    tpu.vector_store %arg7[%c0_188, %c4_189, %c0_190], %398 {strides = array<i32>} : memref<8x8x128xf32, #tpu.memory_space<vmem>>, vector<8x1x128xf32>,
    %399 = vector.extract_strided_slice %378 {offsets = [40, 0], sizes = [8, 128], strides = [1, 1]} : vector<64x128xf32> to vector<8x128xf32>
    %c0_191 = arith.constant 0 : index
    %c5_192 = arith.constant 5 : index
    %c0_193 = arith.constant 0 : index
    %400 = vector.load %arg7[%c0_191, %c5_192, %c0_193] : memref<8x8x128xf32, #tpu.memory_space<vmem>>, vector<8x1x128xf32>
    %401 = vector.shape_cast %400 : vector<8x1x128xf32> to vector<8x128xf32>
    %402 = vector.shape_cast %399 : vector<8x128xf32> to vector<8x1x128xf32>
    tpu.vector_store %arg7[%c0_191, %c5_192, %c0_193], %402 {strides = array<i32>} : memref<8x8x128xf32, #tpu.memory_space<vmem>>, vector<8x1x128xf32>,
    %403 = vector.extract_strided_slice %378 {offsets = [48, 0], sizes = [8, 128], strides = [1, 1]} : vector<64x128xf32> to vector<8x128xf32>
    %c0_194 = arith.constant 0 : index
    %c6_195 = arith.constant 6 : index
    %c0_196 = arith.constant 0 : index
    %404 = vector.load %arg7[%c0_194, %c6_195, %c0_196] : memref<8x8x128xf32, #tpu.memory_space<vmem>>, vector<8x1x128xf32>
    %405 = vector.shape_cast %404 : vector<8x1x128xf32> to vector<8x128xf32>
    %406 = vector.shape_cast %403 : vector<8x128xf32> to vector<8x1x128xf32>
    tpu.vector_store %arg7[%c0_194, %c6_195, %c0_196], %406 {strides = array<i32>} : memref<8x8x128xf32, #tpu.memory_space<vmem>>, vector<8x1x128xf32>,
    %407 = vector.extract_strided_slice %378 {offsets = [56, 0], sizes = [8, 128], strides = [1, 1]} : vector<64x128xf32> to vector<8x128xf32>
    %c0_197 = arith.constant 0 : index
    %c7_198 = arith.constant 7 : index
    %c0_199 = arith.constant 0 : index
    %408 = vector.load %arg7[%c0_197, %c7_198, %c0_199] : memref<8x8x128xf32, #tpu.memory_space<vmem>>, vector<8x1x128xf32>
    %409 = vector.shape_cast %408 : vector<8x1x128xf32> to vector<8x128xf32>
    %410 = vector.shape_cast %407 : vector<8x128xf32> to vector<8x1x128xf32>
    tpu.vector_store %arg7[%c0_197, %c7_198, %c0_199], %410 {strides = array<i32>} : memref<8x8x128xf32, #tpu.memory_space<vmem>>, vector<8x1x128xf32>,
    return
  }
}

</mosaic_0001>

<bundles_post_ra>
// kernel: _lambda_.1
= control target key start
LH: loop header
LB: loop body
LE: loop exit
PB: predicated region body
PF: predicated region fallthrough
CT: control target
= control target key end

     0   :  { %12 = vsyncpa [#allocation7], 0  ;;  %s5108_s0 = inlined_call_operand.hbm [shape: s32[2,8], index: 0, kind: input, shape index: {}]   ;;  %s5109_s1 = inlined_call_operand.hbm [shape: f32[50,1,32], index: 1, kind: input, shape index: {}]   ;;  %s5110_s2 = inlined_call_operand.hbm [shape: f32[32,512], index: 2, kind: input, shape index: {}]   ;;  %s5111_s3 = inlined_call_operand.hbm [shape: f32[128,512], index: 3, kind: input, shape index: {}]   ;;  %s5112_s4 = inlined_call_operand.vmem [shape: f32[1,512], index: 4, kind: input, shape index: {}]   ;;  %s5113_s5 = inlined_call_operand.hbm [shape: f32[128,128], index: 5, kind: input, shape index: {}]   ;;  %s5114_s6 = inlined_call_operand.vmem [shape: f32[1,128], index: 6, kind: input, shape index: {}]   ;;  %s5115_s7 = inlined_call_operand.vmem [shape: f32[8,8,128], index: 7, kind: output, shape index: {}]  }
   0x1   :  { %13 = vsyncpa [#allocation6], 0 }
   0x2   :  { %14 = vsyncpa [#allocation10], 0 }
   0x3   :  { %15 = vsyncpa [#allocation13], 0  ;;  %s4135_s24 = smov [#allocation9]   ;;  %s4029_s28 = scalar_lea.hbm %s5110_s2, 2048 }
   0x4   :  { %s41_s25 = sshll.u32 %s4135_s24, 4  ;;  %p4030_p0 = scmp.ne.s32.totalorder %s5110_s2, %s4029_s28  ;;  %s42_s25 = int_to_ptr.vmem [resolvable:$true] %s41_s25 }
   0x5   :  { %p4033_p1 = scmp.lt.u32.totalorder %s4029_s28, %s5110_s2 }
   0x7   :  { %p4035_p2 = pnand %p4033_p1, %p4030_p0 }
   0x9   :  { %4038 = shalt.err (!%p4035_p2)
}
   0xa   :  { %s4039_s10 = scalar_lea.vmem %s42_s25, 2048  ;;  %p4044_p4 = scmp.lt.s32.totalorder %s42_s25, %s42_s25 }
   0xb   :  { %p4040_p3 = scmp.ne.s32.totalorder %s42_s25, %s4039_s10  ;;  %p4045_p5 = scmp.lt.s32.totalorder %s4039_s10, %s4039_s10 }
   0xd   :  { %p4046_p6 = por %p4045_p5, %p4044_p4 }
   0xf   :  { %p4047_p7 = pnand %p4046_p6, %p4040_p3 }
  0x11   :  { %4050 = shalt.err (!%p4047_p7)
}
  0x12   :  { %s4136_s11 = smov 512   ;;  %s4137_s12 = smov 32  }
  0x13   :  { %47 = dma.hbm_to_vmem [thread:$0]  %s5110_s2, 2048, %s42_s25, [#allocation10], %s4136_s11, %s4136_s11, %s4137_s12  }
  0x14   :  { %s4051_s17 = scalar_lea.hbm %s5108_s0, 32 }
  0x15   :  { %p4052_p8 = scmp.ne.s32.totalorder %s5108_s0, %s4051_s17  ;;  %p4055_p9 = scmp.lt.u32.totalorder %s4051_s17, %s5108_s0 }
  0x17   :  { %p4057_p10 = pnand %p4055_p9, %p4052_p8 }
  0x19   :  { %4060 = shalt.err (!%p4057_p10)
}
  0x1a   :  { %s4138_s22 = smov [#allocation5]   ;;  %s4139_s2 = smov [#allocation8]  }
  0x1b   :  { %23 = dma.hbm_to_smem %s5108_s0, 32, %s4138_s22, [#allocation7]  }
  0x1c   :  { %s29_s25 = sshll.u32 %s4139_s2, 4  ;;  %s4061_s28 = scalar_lea.hbm %s5109_s1, 800  ;;  %s30_s25 = int_to_ptr.vmem [resolvable:$true] %s29_s25 }
  0x1d   :  { %p4062_p11 = scmp.ne.s32.totalorder %s5109_s1, %s4061_s28  ;;  %p4065_p12 = scmp.lt.u32.totalorder %s4061_s28, %s5109_s1 }
  0x1f   :  { %p4067_p13 = pnand %p4065_p12, %p4062_p11 }
  0x21   :  { %4070 = shalt.err (!%p4067_p13)
}
  0x22   :  { %s4071_s10 = scalar_lea.vmem %s30_s25, 800  ;;  %p4076_p1 = scmp.lt.s32.totalorder %s30_s25, %s30_s25 }
  0x23   :  { %p4072_p0 = scmp.ne.s32.totalorder %s30_s25, %s4071_s10  ;;  %p4077_p2 = scmp.lt.s32.totalorder %s4071_s10, %s4071_s10 }
  0x25   :  { %p4078_p3 = por %p4077_p2, %p4076_p1 }
  0x27   :  { %p4079_p4 = pnand %p4078_p3, %p4072_p0 }
  0x29   :  { %4082 = shalt.err (!%p4079_p4)
}
  0x2a   :  { %s4140_s0 = smov 16   ;;  %s4141_s13 = smov 1  }
  0x2b   :  { %35 = dma.hbm_to_vmem [thread:$0]  %s5109_s1, 800, %s30_s25, [#allocation6], %s4140_s0, %s4140_s0, %s4141_s13  }
  0x2c   :  { %s4142_s16 = smov [#allocation11]   ;;  %s4143_s18 = smov [#allocation12]  }
  0x2d   :  { %s53_s17 = sshll.u32 %s4142_s16, 4  ;;  %s67_s19 = sshll.u32 %s4143_s18, 4  ;;  %s54_s17 = int_to_ptr.vmem [resolvable:$true] %s53_s17  ;;  %s68_s19 = int_to_ptr.vmem [resolvable:$true] %s67_s19 }
  0x2e   :  { %s4083_s22 = scalar_lea.hbm %s5111_s3, 8192 }
  0x2f   :  { %p4084_p5 = scmp.ne.s32.totalorder %s5111_s3, %s4083_s22  ;;  %p4087_p6 = scmp.lt.u32.totalorder %s4083_s22, %s5111_s3 }
  0x31   :  { %p4089_p7 = pnand %p4087_p6, %p4084_p5 }
  0x33   :  { %4092 = shalt.err (!%p4089_p7)
}
  0x34   :  { %s4093_s1 = scalar_lea.vmem %s54_s17, 8192  ;;  %p4098_p9 = scmp.lt.s32.totalorder %s54_s17, %s54_s17 }
  0x35   :  { %p4094_p8 = scmp.ne.s32.totalorder %s54_s17, %s4093_s1  ;;  %p4099_p10 = scmp.lt.s32.totalorder %s4093_s1, %s4093_s1 }
  0x37   :  { %p4100_p11 = por %p4099_p10, %p4098_p9 }
  0x39   :  { %p4101_p12 = pnand %p4100_p11, %p4094_p8 }
  0x3b   :  { %4104 = shalt.err (!%p4101_p12)
}
  0x3c   :  { %59 = dma.hbm_to_vmem [thread:$0]  %s5111_s3, 8192, %s54_s17, [#allocation10], %s4136_s11, %s4136_s11, %s4137_s12  }
  0x3d   :  { %s4105_s30 = scalar_lea.hbm %s5113_s5, 2048 }
  0x3e   :  { %p4106_p13 = scmp.ne.s32.totalorder %s5113_s5, %s4105_s30  ;;  %p4109_p0 = scmp.lt.u32.totalorder %s4105_s30, %s5113_s5 }
  0x40   :  { %p4111_p1 = pnand %p4109_p0, %p4106_p13 }
  0x42   :  { %4114 = shalt.err (!%p4111_p1)
}
  0x43   :  { %s4115_s13 = scalar_lea.vmem %s68_s19, 2048  ;;  %p4120_p3 = scmp.lt.s32.totalorder %s68_s19, %s68_s19 }
  0x44   :  { %p4116_p2 = scmp.ne.s32.totalorder %s68_s19, %s4115_s13  ;;  %p4121_p4 = scmp.lt.s32.totalorder %s4115_s13, %s4115_s13 }
  0x46   :  { %p4122_p5 = por %p4121_p4, %p4120_p3 }
  0x48   :  { %p4123_p6 = pnand %p4122_p5, %p4116_p2 }
  0x4a   :  { %4126 = shalt.err (!%p4123_p6)
}
  0x4b   :  { %s4144_s3 = smov 128   ;;  %s4145_s11 = smov 8  }
  0x4c   :  { %73 = dma.hbm_to_vmem [thread:$0]  %s5113_s5, 2048, %s68_s19, [#allocation13], %s4144_s3, %s4144_s3, %s4145_s11  }
  0x4d   :  { %4127 = dma.done.wait [#allocation7], 32  }
  0x4e   :  { %4128 = vsyncadd [#allocation7], 4294967264 }
  0x4f   :  { %4129 = dma.done.wait [#allocation6], 800  }
  0x50   :  { %4130 = vsyncadd [#allocation6], 4294966496 }
  0x51   :  { %4131 = dma.done.wait [#allocation10], 10240  }
  0x52   :  { %4132 = vsyncadd [#allocation10], 4294957056 }
  0x53   :  { %4133 = dma.done.wait [#allocation13], 2048  }
  0x54   :  { %4134 = vsyncadd [#allocation13], 4294965248 }
  0x55   :  { %91 = sfence }
  0x56   :  { %v177_v0 = vld [vmem:[#allocation9 + $0x18] sm:$0xff]  ;;  %v176_v2 = vld [vmem:[#allocation9 + $0x10] sm:$0xff]  ;;  %vm92_vm0 = vcmask 261120   ;;  %v4146_v7 = vmov 0.0   ;;  %s4257_s5 = sld [smem:[#allocation5]]  ;;  %v499_v12 = vld [vmem:[#allocation11 + $0x8] sm:$0xff] }
  0x57   :  { %v181_v1 = vld [vmem:[#allocation9 + $0x38] sm:$0xff]  ;;  %v180_v4 = vld [vmem:[#allocation9 + $0x30] sm:$0xff]  ;;  %413 = vmatprep.mubr.f32.mxu1 %v4146_v7  ;;  %93 = vst.msk [vmem:[#allocation2] sm:$0xff] %vm92_vm0, %v4146_v7  ;;  %94 = vst.msk [vmem:[#allocation2 + $0x8] sm:$0xff] %vm92_vm0, %v4146_v7  ;;  %300 = vmatprep.mubr.f32.mxu0 %v4146_v7  ;;  %s3108_s15 = sld [smem:[#allocation5 + $0x80]]  ;;  %s3109_s16 = sld [smem:[#allocation5 + $0x1]] }
  0x58   :  { %v3272_v3 = vpack.c.bf16 %v181_v1, %v177_v0  ;;  %v185_v5 = vld [vmem:[#allocation9 + $0x58] sm:$0xff]  ;;  %95 = vst.msk [vmem:[#allocation2 + $0x10] sm:$0xff] %vm92_vm0, %v4146_v7  ;;  %96 = vst.msk [vmem:[#allocation2 + $0x18] sm:$0xff] %vm92_vm0, %v4146_v7  ;;  %v3274_v8 = vpack.c.bf16 %v180_v4, %v176_v2  ;;  %v184_v10 = vld [vmem:[#allocation9 + $0x50] sm:$0xff]  ;;  %s3110_s17 = sld [smem:[#allocation5 + $0x81]]  ;;  %s3111_s18 = sld [smem:[#allocation5 + $0x2]] }
  0x59   :  { %v189_v6 = vld [vmem:[#allocation9 + $0x78] sm:$0xff]  ;;  %97 = vst.msk [vmem:[#allocation2 + $0x20] sm:$0xff] %vm92_vm0, %v4146_v7  ;;  %98 = vst.msk [vmem:[#allocation2 + $0x28] sm:$0xff] %vm92_vm0, %v4146_v7  ;;  %v188_v11 = vld [vmem:[#allocation9 + $0x70] sm:$0xff]  ;;  %vm104_vm1 = vcmask 253952   ;;  %s3112_s19 = sld [smem:[#allocation5 + $0x82]] }
  0x5a   :  { %99 = vst.msk [vmem:[#allocation2 + $0x30] sm:$0xff] %vm92_vm0, %v4146_v7  ;;  %100 = vst.msk [vmem:[#allocation2 + $0x38] sm:$0xff] %vm92_vm0, %v4146_v7  ;;  %v3276_v9 = vpack.c.bf16 %v189_v6, %v185_v5  ;;  %3273 = vmatprep.subr.bf16.mxu1 %v3272_v3  ;;  %v503_v13 = vld [vmem:[#allocation11 + $0x28] sm:$0xff]  ;;  %v3278_v14 = vpack.c.bf16 %v188_v11, %v184_v10  ;;  %s4276_s20 = sld [smem:[#allocation5 + $0x3]]  ;;  %s4283_s24 = sld [smem:[#allocation5 + $0x4]]  ;;  %v498_v19 = vld [vmem:[#allocation11] sm:$0xff] }
  0x5b   :  { %3275 = vmatpush1.bf16.msra.mxu1 %v3274_v8  ;;  %v4274_v15 = vpack.c.bf16 %v503_v13, %v499_v12  ;;  %s4279_s22 = sld [smem:[#allocation5 + $0x83]]  ;;  %s4286_s26 = sld [smem:[#allocation5 + $0x84]]  ;;  %v502_v20 = vld [vmem:[#allocation11 + $0x20] sm:$0xff]  ;;  %v507_v22 = vld [vmem:[#allocation11 + $0x48] sm:$0xff] }
  0x5c   :  { %3277 = vmatprep.subr.bf16.mxu1 %v3276_v9  ;;  %s102_s21 = scalar_lea.vmem [#allocation8], %s4257_s5  ;;  %s4290_s27 = sld [smem:[#allocation5 + $0x5]]  ;;  %v511_v24 = vld [vmem:[#allocation11 + $0x68] sm:$0xff]  ;;  %v506_v26 = vld [vmem:[#allocation11 + $0x40] sm:$0xff]  ;;  %v4297_v30 = vpack.c.bf16 %v502_v20, %v498_v19 }
  0x5d   :  { %v103_v16 = vld [vmem:[%s102_s21] sm:$0x1]  ;;  %s107_s23 = scalar_lea.vmem [#allocation8], %s3108_s15  ;;  %s111_s2 = scalar_lea.vmem [#allocation8], %s3109_s16  ;;  %v175_v29 = vld [vmem:[#allocation9 + $0x8] sm:$0xff]  ;;  %v4301_v34 = vpack.c.bf16 %v511_v24, %v507_v22 }
  0x5e   :  { %105 = vst.msk [vmem:[#allocation2] sm:$0x1] %vm104_vm1, %v103_v16  ;;  %v108_v17 = vld [vmem:[%s107_s23] sm:$0x1]  ;;  %s115_s1 = scalar_lea.vmem [#allocation8], %s3110_s17  ;;  %s119_s25 = scalar_lea.vmem [#allocation8], %s3111_s18 }
  0x5f   :  { %3279 = vmatpush1.bf16.msra.mxu1 %v3278_v14  ;;  %109 = vst.msk [vmem:[#allocation2 + $0x1] sm:$0x1] %vm104_vm1, %v108_v17  ;;  %v112_v18 = vld [vmem:[%s111_s2] sm:$0x1]  ;;  %s123_s28 = scalar_lea.vmem [#allocation8], %s3112_s19  ;;  %s4293_s29 = sld [smem:[#allocation5 + $0x85]] }
  0x60   :  { %3281 = vmatprep.subr.bf16.mxu1 %v4274_v15  ;;  %113 = vst.msk [vmem:[#allocation2 + $0x8] sm:$0x1] %vm104_vm1, %v112_v18  ;;  %v116_v21 = vld [vmem:[%s115_s1] sm:$0x1]  ;;  %s127_s30 = scalar_lea.vmem [#allocation8], %s4276_s20  ;;  %v179_v32 = vld [vmem:[#allocation9 + $0x28] sm:$0xff] }
  0x61   :  { %117 = vst.msk [vmem:[#allocation2 + $0x9] sm:$0x1] %vm104_vm1, %v116_v21  ;;  %v120_v23 = vld [vmem:[%s119_s25] sm:$0x1]  ;;  %s131_s8 = scalar_lea.vmem [#allocation8], %s4279_s22  ;;  %v515_v35 = vld [vmem:[#allocation11 + $0x88] sm:$0xff]  ;;  %v3264_v37 = vpack.c.bf16 %v179_v32, %v175_v29 }
  0x62   :  { %121 = vst.msk [vmem:[#allocation2 + $0x10] sm:$0x1] %vm104_vm1, %v120_v23  ;;  %v124_v25 = vld [vmem:[%s123_s28] sm:$0x1]  ;;  %s135_s9 = scalar_lea.vmem [#allocation8], %s4283_s24  ;;  %v519_v40 = vld [vmem:[#allocation11 + $0xa8] sm:$0xff] }
  0x63   :  { %v510_v27 = vld [vmem:[#allocation11 + $0x60] sm:$0xff]  ;;  %125 = vst.msk [vmem:[#allocation2 + $0x11] sm:$0x1] %vm104_vm1, %v124_v25  ;;  %s139_s10 = scalar_lea.vmem [#allocation8], %s4286_s26  ;;  %s4309_s0 = sld [smem:[#allocation5 + $0x6]]  ;;  %3265 = vmatprep.subr.bf16.mxu0 %v3264_v37  ;;  %v183_v45 = vld [vmem:[#allocation9 + $0x48] sm:$0xff]  ;;  %v4324_v50 = vpack.c.bf16 %v519_v40, %v515_v35 }
  0x64   :  { %v128_v28 = vld [vmem:[%s127_s30] sm:$0x1]  ;;  %s4314_s13 = sld [smem:[#allocation5 + $0x86]]  ;;  %v4320_v47 = vpack.c.bf16 %v510_v27, %v506_v26  ;;  %s143_s3 = scalar_lea.vmem [#allocation8], %s4290_s27  ;;  %v187_v49 = vld [vmem:[#allocation9 + $0x68] sm:$0xff]  ;;  %v501_v35 = vld [vmem:[#allocation11 + $0x18] sm:$0xff] }
  0x65   :  { %129 = vst.msk [vmem:[#allocation2 + $0x18] sm:$0x1] %vm104_vm1, %v128_v28  ;;  %v132_v31 = vld [vmem:[%s131_s8] sm:$0x1]  ;;  %s147_s11 = scalar_lea.vmem [#allocation8], %s4293_s29  ;;  %v3268_v52 = vpack.c.bf16 %v187_v49, %v183_v45  ;;  %s4328_s12 = sld [smem:[#allocation5 + $0x7]] }
  0x66   :  { %v174_v33 = vld [vmem:[#allocation9] sm:$0xff]  ;;  %133 = vst.msk [vmem:[#allocation2 + $0x19] sm:$0x1] %vm104_vm1, %v132_v31  ;;  %v4305_v39 = vld [vmem:[#allocation2] sm:$0xff]  ;;  %s4331_s14 = sld [smem:[#allocation5 + $0x87]]  ;;  %v517_v49 = vld [vmem:[#allocation11 + $0x98] sm:$0xff] }
  0x67   :  { %v136_v36 = vld [vmem:[%s135_s9] sm:$0x1]  ;;  %3131 = vmatmul.mubr.msk.f32.vlgmr.msra.gmra.mrb[0].mxu1 %vm92_vm0, %v4305_v39  ;;  %v523_v55 = vld [vmem:[#allocation11 + $0xc8] sm:$0xff]  ;;  %v500_v40 = vld [vmem:[#allocation11 + $0x10] sm:$0xff] }
  0x68   :  { %v178_v38 = vld [vmem:[#allocation9 + $0x20] sm:$0xff]  ;;  %137 = vst.msk [vmem:[#allocation2 + $0x20] sm:$0x1] %vm104_vm1, %v136_v36  ;;  %3283 = vmatpush1.bf16.msra.mxu1 %v4297_v30  ;;  %419 = vmatprep.mubr.f32.mxu1 %v4146_v7  ;;  %v4318_v46 = vld [vmem:[#allocation2 + $0x8] sm:$0xff]  ;;  %v527_v56 = vld [vmem:[#allocation11 + $0xe8] sm:$0xff] }
  0x69   :  { %v140_v41 = vld [vmem:[%s139_s10] sm:$0x1]  ;;  %v3266_v42 = vpack.c.bf16 %v178_v38, %v174_v33  ;;  %3285 = vmatprep.subr.bf16.mxu1 %v4301_v34  ;;  %v4340_v60 = vpack.c.bf16 %v527_v56, %v523_v55  ;;  %s151_s5 = scalar_lea.vmem [#allocation8], %s4309_s0  ;;  %v531_v0 = vld [vmem:[#allocation11 + $0x108] sm:$0xff]  ;;  %v505_v36 = vld [vmem:[#allocation11 + $0x38] sm:$0xff] }
  0x6a   :  { %v514_v43 = vld [vmem:[#allocation11 + $0x80] sm:$0xff]  ;;  %141 = vst.msk [vmem:[#allocation2 + $0x21] sm:$0x1] %vm104_vm1, %v140_v41  ;;  %v535_v1 = vld [vmem:[#allocation11 + $0x128] sm:$0xff]  ;;  %s155_s15 = scalar_lea.vmem [#allocation8], %s4314_s13  ;;  %v504_v41 = vld [vmem:[#allocation11 + $0x30] sm:$0xff] }
  0x6b   :  { %v518_v44 = vld [vmem:[#allocation11 + $0xa0] sm:$0xff]  ;;  %3267 = vmatpush1.bf16.msra.mxu0 %v3266_v42  ;;  %3132 = vmatmul.mubr.msk.f32.gmra.mrb[2].mxu1 %vm92_vm0, %v4318_v46  ;;  %s159_s16 = scalar_lea.vmem [#allocation8], %s4328_s12  ;;  %v4354_v6 = vpack.c.bf16 %v535_v1, %v531_v0  ;;  %v539_v11 = vld [vmem:[#allocation11 + $0x148] sm:$0xff]  ;;  %v509_v42 = vld [vmem:[#allocation11 + $0x58] sm:$0xff] }
  0x6c   :  { %v144_v48 = vld [vmem:[%s143_s3] sm:$0x1]  ;;  %3269 = vmatprep.subr.bf16.mxu0 %v3268_v52  ;;  %3287 = vmatpush1.bf16.msra.mxu1 %v4320_v47  ;;  %v168_v58 = vld [vmem:[#allocation2 + $0x10] sm:$0xff]  ;;  %v4337_v59 = vpack.c.bf16 %v518_v44, %v514_v43  ;;  %s163_s17 = scalar_lea.vmem [#allocation8], %s4331_s14  ;;  %v543_v12 = vld [vmem:[#allocation11 + $0x168] sm:$0xff]  ;;  %v4416_v44 = vpack.c.bf16 %v504_v41, %v500_v40  ;;  %v192_v40 = vlaneseq }
  0x6d   :  { %145 = vst.msk [vmem:[#allocation2 + $0x28] sm:$0x1] %vm104_vm1, %v144_v48  ;;  %v148_v51 = vld [vmem:[%s147_s11] sm:$0x1]  ;;  %425 = vmatprep.mubr.f32.mxu1 %v4146_v7  ;;  %3289 = vmatprep.subr.bf16.mxu1 %v4324_v50  ;;  %v4370_v16 = vpack.c.bf16 %v543_v12, %v539_v11  ;;  %v547_v19 = vld [vmem:[#allocation11 + $0x188] sm:$0xff]  ;;  %v513_v43 = vld [vmem:[#allocation11 + $0x78] sm:$0xff] }
  0x6e   :  { %v182_v53 = vld [vmem:[#allocation9 + $0x40] sm:$0xff]  ;;  %149 = vst.msk [vmem:[#allocation2 + $0x29] sm:$0x1] %vm104_vm1, %v148_v51  ;;  %v551_v20 = vld [vmem:[#allocation11 + $0x1a8] sm:$0xff]  ;;  %v4419_v45 = vpack.c.bf16 %v513_v43, %v509_v42  ;;  %v512_v48 = vld [vmem:[#allocation11 + $0x70] sm:$0xff]  ;;  %v4495_v41 = vshrl.u32 %v192_v40, 7 }
  0x6f   :  { %v186_v54 = vld [vmem:[#allocation9 + $0x60] sm:$0xff]  ;;  %3133 = vmatmul.mubr.msk.f32.gmra.mrb[4].mxu1 %vm92_vm0, %v168_v58  ;;  %v4383_v23 = vpack.c.bf16 %v551_v20, %v547_v19  ;;  %v555_v26 = vld [vmem:[#allocation11 + $0x1c8] sm:$0xff]  ;;  %v521_v51 = vld [vmem:[#allocation11 + $0xb8] sm:$0xff] }
  0x70   :  { %v3270_v57 = vpack.c.bf16 %v186_v54, %v182_v53  ;;  %v522_v61 = vld [vmem:[#allocation11 + $0xc0] sm:$0xff]  ;;  %3291 = vmatpush1.bf16.msra.mxu1 %v4337_v59  ;;  %431 = vmatprep.mubr.f32.mxu1 %v4146_v7  ;;  %v559_v27 = vld [vmem:[#allocation11 + $0x1e8] sm:$0xff]  ;;  %v4431_v53 = vpack.c.bf16 %v521_v51, %v517_v49  ;;  %v516_v54 = vld [vmem:[#allocation11 + $0x90] sm:$0xff]  ;;  %v194_v42 = vsub.s32 0, %v4495_v41 }
  0x71   :  { %v526_v62 = vld [vmem:[#allocation11 + $0xe0] sm:$0xff]  ;;  %3293 = vmatprep.subr.bf16.mxu1 %v4340_v60  ;;  %v170_v13 = vld [vmem:[#allocation2 + $0x20] sm:$0xff]  ;;  %v4395_v31 = vpack.c.bf16 %v559_v27, %v555_v26  ;;  %v525_v56 = vld [vmem:[#allocation11 + $0xd8] sm:$0xff] }
  0x72   :  { %v152_v63 = vld [vmem:[%s151_s5] sm:$0x1]  ;;  %3271 = vmatpush1.bf16.msra.mxu0 %v3270_v57  ;;  %v4350_v4 = vpack.c.bf16 %v526_v62, %v522_v61  ;;  %v520_v55 = vld [vmem:[#allocation11 + $0xb0] sm:$0xff]  ;;  %v529_v57 = vld [vmem:[#allocation11 + $0xf8] sm:$0xff] }
  0x73   :  { %153 = vst.msk [vmem:[#allocation2 + $0x30] sm:$0x1] %vm104_vm1, %v152_v63  ;;  %v156_v2 = vld [vmem:[%s155_s15] sm:$0x1]  ;;  %3345 = vmatprep.subr.bf16.mxu0 %v4274_v15  ;;  %v4441_v61 = vpack.c.bf16 %v529_v57, %v525_v56  ;;  %v524_v62 = vld [vmem:[#allocation11 + $0xd0] sm:$0xff]  ;;  %v533_v0 = vld [vmem:[#allocation11 + $0x118] sm:$0xff] }
  0x74   :  { %157 = vst.msk [vmem:[#allocation2 + $0x31] sm:$0x1] %vm104_vm1, %v156_v2  ;;  %v169_v3 = vld [vmem:[#allocation2 + $0x18] sm:$0xff]  ;;  %3295 = vmatpush1.bf16.msra.mxu1 %v4350_v4  ;;  %v528_v63 = vld [vmem:[#allocation11 + $0xf0] sm:$0xff]  ;;  %v537_v1 = vld [vmem:[#allocation11 + $0x138] sm:$0xff] }
  0x75   :  { %v160_v5 = vld [vmem:[%s159_s16] sm:$0x1]  ;;  %3123 = vmatmul.mubr.msk.f32.vlgmr.msra.gmra.mrb[0].mxu0 %vm92_vm0, %v4305_v39  ;;  %3134 = vmatmul.mubr.msk.f32.gmra.mrb[6].mxu1 %vm92_vm0, %v169_v3  ;;  %v171_v21 = vld [vmem:[#allocation2 + $0x28] sm:$0xff]  ;;  %v4407_v39 = vpack.c.bf16 %v505_v36, %v501_v35  ;;  %v4448_v2 = vpack.c.bf16 %v528_v63, %v524_v62 }
  0x76   :  { %v530_v8 = vld [vmem:[#allocation11 + $0x100] sm:$0xff]  ;;  %161 = vst.msk [vmem:[#allocation2 + $0x38] sm:$0x1] %vm104_vm1, %v160_v5  ;;  %3347 = vmatpush1.bf16.msra.mxu0 %v4297_v30  ;;  %306 = vmatprep.mubr.f32.mxu0 %v4146_v7  ;;  %v532_v5 = vld [vmem:[#allocation11 + $0x110] sm:$0xff]  ;;  %v561_v26 = vld [vmem:[#allocation11 + $0x1f8] sm:$0xff] }
  0x77   :  { %v534_v9 = vld [vmem:[#allocation11 + $0x120] sm:$0xff]  ;;  %3349 = vmatprep.subr.bf16.mxu0 %v4301_v34  ;;  %437 = vmatprep.mubr.f32.mxu1 %v4146_v7 }
  0x78   :  { %v164_v10 = vld [vmem:[%s163_s17] sm:$0x1]  ;;  %v4367_v14 = vpack.c.bf16 %v534_v9, %v530_v8  ;;  %3297 = vmatprep.subr.bf16.mxu1 %v4354_v6  ;;  %v536_v8 = vld [vmem:[#allocation11 + $0x130] sm:$0xff]  ;;  %v541_v9 = vld [vmem:[#allocation11 + $0x158] sm:$0xff] }
  0x79   :  { %165 = vst.msk [vmem:[#allocation2 + $0x39] sm:$0x1] %vm104_vm1, %v164_v10  ;;  %v538_v17 = vld [vmem:[#allocation11 + $0x140] sm:$0xff]  ;;  %3124 = vmatmul.mubr.msk.f32.gmra.mrb[2].mxu0 %vm92_vm0, %v4318_v46  ;;  %3135 = vmatmul.mubr.msk.f32.gmra.mrb[8].mxu1 %vm92_vm0, %v170_v13  ;;  %v508_v46 = vld [vmem:[#allocation11 + $0x50] sm:$0xff]  ;;  %v545_v10 = vld [vmem:[#allocation11 + $0x178] sm:$0xff]  ;;  %v4454_v11 = vpack.c.bf16 %v536_v8, %v532_v5  ;;  %v206_v8 = vsub.s32 3, %v4495_v41 }
  0x7a   :  { %v542_v18 = vld [vmem:[#allocation11 + $0x160] sm:$0xff]  ;;  %3351 = vmatpush1.bf16.msra.mxu0 %v4320_v47  ;;  %312 = vmatprep.mubr.f32.mxu0 %v4146_v7  ;;  %v4427_v52 = vpack.c.bf16 %v512_v48, %v508_v46  ;;  %v4457_v12 = vpack.c.bf16 %v545_v10, %v541_v9  ;;  %v198_v46 = vsub.s32 1, %v4495_v41 }
  0x7b   :  { %3353 = vmatprep.subr.bf16.mxu0 %v4324_v50  ;;  %3299 = vmatpush1.bf16.msra.mxu1 %v4367_v14  ;;  %v4380_v22 = vpack.c.bf16 %v542_v18, %v538_v17  ;;  %v546_v24 = vld [vmem:[#allocation11 + $0x180] sm:$0xff]  ;;  %v549_v17 = vld [vmem:[#allocation11 + $0x198] sm:$0xff] }
  0x7c   :  { %443 = vmatprep.mubr.f32.mxu1 %v4146_v7  ;;  %3301 = vmatprep.subr.bf16.mxu1 %v4370_v16  ;;  %v550_v25 = vld [vmem:[#allocation11 + $0x1a0] sm:$0xff]  ;;  %v553_v18 = vld [vmem:[#allocation11 + $0x1b8] sm:$0xff] }
  0x7d   :  { %3125 = vmatmul.mubr.msk.f32.gmra.mrb[4].mxu0 %vm92_vm0, %v168_v58  ;;  %3136 = vmatmul.mubr.msk.f32.gmra.mrb[10].mxu1 %vm92_vm0, %v171_v21  ;;  %v172_v28 = vld [vmem:[#allocation2 + $0x30] sm:$0xff]  ;;  %v4392_v29 = vpack.c.bf16 %v550_v25, %v546_v24  ;;  %v4438_v58 = vpack.c.bf16 %v520_v55, %v516_v54  ;;  %v4463_v20 = vpack.c.bf16 %v553_v18, %v549_v17  ;;  %v552_v24 = vld [vmem:[#allocation11 + $0x1b0] sm:$0xff]  ;;  %v190_v43 = vld [vmem:[%s5112_s4] sm:$0xf] }
  0x7e   :  { %3355 = vmatpush1.bf16.msra.mxu0 %v4337_v59  ;;  %318 = vmatprep.mubr.f32.mxu0 %v4146_v7  ;;  %v554_v32 = vld [vmem:[#allocation11 + $0x1c0] sm:$0xff]  ;;  %v557_v25 = vld [vmem:[#allocation11 + $0x1d8] sm:$0xff]  ;;  %v4502_v48 = vrot.slane %v190_v43, %v194_v42  ;;  %v4504_v49 = vrot.slane %v190_v43, %v198_v46  ;;  %v4512_v17 = vrot.slane %v190_v43, %v206_v8 }
  0x7f   :  { %3357 = vmatprep.subr.bf16.mxu0 %v4340_v60  ;;  %3303 = vmatpush1.bf16.msra.mxu1 %v4380_v22  ;;  %v558_v33 = vld [vmem:[#allocation11 + $0x1e0] sm:$0xff] }
  0x80   :  { %449 = vmatprep.mubr.f32.mxu1 %v4146_v7  ;;  %3305 = vmatprep.subr.bf16.mxu1 %v4383_v23  ;;  %v173_v37 = vld [vmem:[#allocation2 + $0x38] sm:$0xff]  ;;  %v4404_v38 = vpack.c.bf16 %v558_v33, %v554_v32  ;;  %v556_v32 = vld [vmem:[#allocation11 + $0x1d0] sm:$0xff] }
  0x81   :  { %3126 = vmatmul.mubr.msk.f32.gmra.mrb[6].mxu0 %vm92_vm0, %v169_v3  ;;  %3137 = vmatmul.mubr.msk.f32.gmra.mrb[12].mxu1 %vm92_vm0, %v172_v28  ;;  %v4451_v3 = vpack.c.bf16 %v537_v1, %v533_v0  ;;  %v560_v33 = vld [vmem:[#allocation11 + $0x1f0] sm:$0xff]  ;;  %v202_v1 = vsub.s32 2, %v4495_v41 }
  0x82   :  { %3359 = vmatpush1.bf16.msra.mxu0 %v4350_v4  ;;  %324 = vmatprep.mubr.f32.mxu0 %v4146_v7  ;;  %v4472_v35 = vpack.c.bf16 %v560_v33, %v556_v32 }
  0x83   :  { %3361 = vmatprep.subr.bf16.mxu0 %v4354_v6  ;;  %3307 = vmatpush1.bf16.msra.mxu1 %v4392_v29 }
  0x84   :  { %455 = vmatprep.mubr.f32.mxu1 %v4146_v7  ;;  %3309 = vmatprep.subr.bf16.mxu1 %v4395_v31 }
  0x85   :  { %3127 = vmatmul.mubr.msk.f32.gmra.mrb[8].mxu0 %vm92_vm0, %v170_v13  ;;  %3138 = vmatmul.mubr.msk.f32.gmra.mrb[14].mxu1 %vm92_vm0, %v173_v37  ;;  %v544_v13 = vld [vmem:[#allocation11 + $0x170] sm:$0xff] }
  0x86   :  { %3363 = vmatpush1.bf16.msra.mxu0 %v4367_v14  ;;  %330 = vmatprep.mubr.f32.mxu0 %v4146_v7 }
  0x87   :  { %3365 = vmatprep.subr.bf16.mxu0 %v4370_v16  ;;  %3311 = vmatpush1.bf16.msra.mxu1 %v4404_v38 }
  0x88   :  { %626 = vmatprep.mubr.f32.mxu1 %v4146_v7  ;;  %3313 = vmatprep.subr.bf16.mxu1 %v4407_v39 }
  0x89   :  { %3128 = vmatmul.mubr.msk.f32.gmra.mrb[10].mxu0 %vm92_vm0, %v171_v21  ;;  %v548_v21 = vld [vmem:[#allocation11 + $0x190] sm:$0xff] }
  0x8a   :  { %3367 = vmatpush1.bf16.msra.mxu0 %v4380_v22  ;;  %336 = vmatprep.mubr.f32.mxu0 %v4146_v7  ;;  %v4466_v27 = vpack.c.bf16 %v552_v24, %v548_v21 }
  0x8b   :  { %627 = vmatmul.mubr.f32.vlgmr.msra.gmra.mrb[16].mxu1 %v4146_v7  ;;  %3369 = vmatprep.subr.bf16.mxu0 %v4383_v23 }
  0x8c   :  { %3315 = vmatpush1.bf16.msra.mxu1 %v4416_v44  ;;  %697 = vmatprep.mubr.f32.mxu1 %v4146_v7 }
  0x8d   :  { %3317 = vmatprep.subr.bf16.mxu1 %v4419_v45  ;;  %3129 = vmatmul.mubr.msk.f32.gmra.mrb[12].mxu0 %vm92_vm0, %v172_v28  ;;  %v4469_v28 = vpack.c.bf16 %v561_v26, %v557_v25 }
  0x8e   :  { %3371 = vmatpush1.bf16.msra.mxu0 %v4392_v29  ;;  %342 = vmatprep.mubr.f32.mxu0 %v4146_v7 }
  0x8f   :  { %3373 = vmatprep.subr.bf16.mxu0 %v4395_v31 }
  0x90   :  { %3319 = vmatpush1.bf16.msra.mxu1 %v4427_v52 }
  0x91   :  { %3321 = vmatprep.subr.bf16.mxu1 %v4431_v53  ;;  %3130 = vmatmul.mubr.msk.f32.gmra.mrb[14].mxu0 %vm92_vm0, %v173_v37 }
  0x92   :  { %3375 = vmatpush1.bf16.msra.mxu0 %v4404_v38  ;;  %866 = vmatprep.mubr.f32.mxu0 %v4146_v7 }
  0x93   :  { %3409 = vmatprep.subr.bf16.mxu0 %v4274_v15  ;;  %v540_v15 = vld [vmem:[#allocation11 + $0x150] sm:$0xff] }
  0x94   :  { %3323 = vmatpush1.bf16.msra.mxu1 %v4438_v58  ;;  %v4460_v19 = vpack.c.bf16 %v544_v13, %v540_v15  ;;  %v4510_v15 = vrot.slane %v190_v43, %v202_v1 }
  0x95   :  { %3325 = vmatprep.subr.bf16.mxu1 %v4441_v61 }
  0x98   :  { %3327 = vmatpush1.bf16.msra.mxu1 %v4448_v2 }
  0x99   :  { %3329 = vmatprep.subr.bf16.mxu1 %v4451_v3 }
  0x9c   :  { %3331 = vmatpush1.bf16.msra.mxu1 %v4454_v11 }
  0x9d   :  { %3333 = vmatprep.subr.bf16.mxu1 %v4457_v12 }
  0xa0   :  { %3335 = vmatpush1.bf16.msra.mxu1 %v4460_v19 }
  0xa1   :  { %3337 = vmatprep.subr.bf16.mxu1 %v4463_v20 }
  0xa4   :  { %3339 = vmatpush1.bf16.msra.mxu1 %v4466_v27 }
  0xa5   :  { %3341 = vmatprep.subr.bf16.mxu1 %v4469_v28 }
  0xa8   :  { %3343 = vmatpush1.bf16.msra.mxu1 %v4472_v35 }
  0xa9   :  { %3377 = vmatprep.subr.bf16.mxu1 %v4407_v39 }
  0xab   :  { %698 = vmatmul.mubr.f32.vlgmr.msra.gmra.mrb[0].mxu1 %v4146_v7 }
  0xac   :  { %3379 = vmatpush1.bf16.msra.mxu1 %v4416_v44  ;;  %937 = vmatprep.mubr.f32.mxu1 %v4146_v7 }
  0xad   :  { %3381 = vmatprep.subr.bf16.mxu1 %v4419_v45 }
  0xb0   :  { %3383 = vmatpush1.bf16.msra.mxu1 %v4427_v52 }
  0xb1   :  { %3385 = vmatprep.subr.bf16.mxu1 %v4431_v53 }
  0xb4   :  { %3387 = vmatpush1.bf16.msra.mxu1 %v4438_v58 }
  0xb5   :  { %3389 = vmatprep.subr.bf16.mxu1 %v4441_v61 }
  0xb8   :  { %3391 = vmatpush1.bf16.msra.mxu1 %v4448_v2 }
  0xb9   :  { %3393 = vmatprep.subr.bf16.mxu1 %v4451_v3 }
  0xbc   :  { %3395 = vmatpush1.bf16.msra.mxu1 %v4454_v11 }
  0xbd   :  { %3397 = vmatprep.subr.bf16.mxu1 %v4457_v12 }
  0xc0   :  { %3399 = vmatpush1.bf16.msra.mxu1 %v4460_v19 }
  0xc1   :  { %3401 = vmatprep.subr.bf16.mxu1 %v4463_v20 }
  0xc4   :  { %3403 = vmatpush1.bf16.msra.mxu1 %v4466_v27 }
  0xc5   :  { %3405 = vmatprep.subr.bf16.mxu1 %v4469_v28 }
  0xc8   :  { %3407 = vmatpush1.bf16.msra.mxu1 %v4472_v35 }
  0xc9   :  { %3441 = vmatprep.subr.bf16.mxu1 %v4407_v39 }
 0x148   :  { %v302_v36 = vpop.f32.mrb[0].mxu0 }
 0x149   :  { %v304_v37 = vpop.f32.mrb[1].mxu0  ;;  %v303_v51 = vadd.f32 %v302_v36, %v4502_v48 }
 0x14a   :  { %v305_v54 = vadd.f32 %v304_v37, %v4504_v49 }
 0x15e   :  { %v628_v55 = vpop.f32.mrb[16].mxu1 }
 0x15f   :  { %v704_v56 = vadd.f32 %v628_v55, %v303_v51  ;;  %v630_v57 = vpop.f32.mrb[17].mxu1 }
 0x160   :  { %v705_v62 = vadd.f32 %v630_v57, %v305_v54 }
 0x161   :  { %v3139_v0 = vmul.f32 -1.442695, %v704_v56 }
 0x162   :  { %v3140_v63 = vmul.f32 -1.442695, %v705_v62 }
 0x164   :  { %3901 = vpow2.f32 %v3140_v63 }
 0x165   :  { %3903 = vpow2.f32 %v3139_v0 }
 0x16e   :  { %v3902_v5 = vpop.eup %3901 }
 0x16f   :  { %v3904_v9 = vpop.eup %3903  ;;  %v717_v10 = vadd.f32 1.0, %v3902_v5 }
 0x170   :  { %v711_v13 = vadd.f32 1.0, %v3904_v9 }
 0x171   :  { %3905 = vrcp.f32 %v717_v10 }
 0x172   :  { %3907 = vrcp.f32 %v711_v13  ;;  %v1236_v13 = vld [vmem:[#allocation11 + $0x80] sm:$0xff] }
 0x17b   :  { %v3906_v32 = vpop.eup %3905 }
 0x17c   :  { %v3908_v33 = vpop.eup %3907  ;;  %v727_v37 = vmul.f32 0.0, %v3906_v32  ;;  %v1244_v32 = vld [vmem:[#allocation11 + $0xc0] sm:$0xff] }
 0x17e   :  { %v699_v18 = vpop.f32.mrb[0].mxu1 }
 0x17f   :  { %v3842_v21 = vadd.f32 %v699_v18, %v4510_v15  ;;  %v701_v24 = vpop.f32.mrb[1].mxu1  ;;  %v1240_v18 = vld [vmem:[#allocation11 + $0xa0] sm:$0xff] }
 0x180   :  { %v3843_v25 = vadd.f32 %v701_v24, %v4512_v17  ;;  %v1245_v24 = vld [vmem:[#allocation11 + $0xc8] sm:$0xff] }
 0x181   :  { %3909 = vtanh.f32 %v3842_v21  ;;  %v4599_v21 = vpack.c.bf16 %v1240_v18, %v1236_v13 }
 0x182   :  { %v3141_v26 = vmul.f32 -1.442695, %v3843_v25  ;;  %v1249_v25 = vld [vmem:[#allocation11 + $0xe8] sm:$0xff] }
 0x184   :  { %3911 = vpow2.f32 %v3141_v26  ;;  %v4603_v26 = vpack.c.bf16 %v1249_v25, %v1245_v24 }
 0x18b   :  { %v3910_v36 = vpop.eup %3909 }
 0x18c   :  { %v728_v40 = vmul.f32 %v3910_v36, %v3908_v33  ;;  %v1248_v33 = vld [vmem:[#allocation11 + $0xe0] sm:$0xff] }
 0x18d   :  { %v4605_v36 = vpack.c.bf16 %v1248_v33, %v1244_v32 }
 0x18e   :  { %v3912_v42 = vpop.eup %3911  ;;  %v4516_v46 = vadd.f32 %v728_v40, %v727_v37  ;;  %v1253_v37 = vld [vmem:[#allocation11 + $0x108] sm:$0xff] }
 0x18f   :  { %v724_v43 = vadd.f32 1.0, %v3912_v42  ;;  %v1257_v40 = vld [vmem:[#allocation11 + $0x128] sm:$0xff] }
 0x190   :  { %3913 = vtanh.f32 %v4516_v46  ;;  %v4609_v42 = vpack.c.bf16 %v1257_v40, %v1253_v37 }
 0x191   :  { %3915 = vrcp.f32 %v724_v43  ;;  %v1256_v43 = vld [vmem:[#allocation11 + $0x120] sm:$0xff] }
 0x19a   :  { %v3914_v51 = vpop.eup %3913 }
 0x19b   :  { %v3916_v54 = vpop.eup %3915 }
 0x19c   :  { %v4519_v55 = vmul.f32 %v3916_v54, %v3914_v51  ;;  %v1261_v54 = vld [vmem:[#allocation11 + $0x148] sm:$0xff] }
 0x19e   :  { %867 = vmatmul.mubr.f32.vlgmr.msra.gmra.mrb[2].mxu0 %v4519_v55  ;;  %938 = vmatmul.mubr.f32.vlgmr.msra.gmra.mrb[2].mxu1 %v4519_v55 }
 0x19f   :  { %3411 = vmatpush1.bf16.msra.mxu0 %v4297_v30  ;;  %3443 = vmatpush1.bf16.msra.mxu1 %v4416_v44 }
 0x1a0   :  { %3413 = vmatprep.subr.bf16.mxu0 %v4301_v34  ;;  %3445 = vmatprep.subr.bf16.mxu1 %v4419_v45 }
 0x1a1   :  { %1107 = vmatprep.mubr.f32.mxu0 %v4146_v7  ;;  %1178 = vmatprep.mubr.f32.mxu1 %v4146_v7 }
 0x1a3   :  { %3415 = vmatpush1.bf16.msra.mxu0 %v4320_v47  ;;  %3447 = vmatpush1.bf16.msra.mxu1 %v4427_v52 }
 0x1a4   :  { %3417 = vmatprep.subr.bf16.mxu0 %v4324_v50  ;;  %3449 = vmatprep.subr.bf16.mxu1 %v4431_v53 }
 0x1a7   :  { %3419 = vmatpush1.bf16.msra.mxu0 %v4337_v59  ;;  %3451 = vmatpush1.bf16.msra.mxu1 %v4438_v58 }
 0x1a8   :  { %3421 = vmatprep.subr.bf16.mxu0 %v4340_v60  ;;  %3453 = vmatprep.subr.bf16.mxu1 %v4441_v61 }
 0x1ab   :  { %3423 = vmatpush1.bf16.msra.mxu0 %v4350_v4  ;;  %3455 = vmatpush1.bf16.msra.mxu1 %v4448_v2 }
 0x1ac   :  { %3425 = vmatprep.subr.bf16.mxu0 %v4354_v6  ;;  %3457 = vmatprep.subr.bf16.mxu1 %v4451_v3 }
 0x1af   :  { %3427 = vmatpush1.bf16.msra.mxu0 %v4367_v14  ;;  %3459 = vmatpush1.bf16.msra.mxu1 %v4454_v11 }
 0x1b0   :  { %3429 = vmatprep.subr.bf16.mxu0 %v4370_v16  ;;  %3461 = vmatprep.subr.bf16.mxu1 %v4457_v12 }
 0x1b3   :  { %3431 = vmatpush1.bf16.msra.mxu0 %v4380_v22  ;;  %3463 = vmatpush1.bf16.msra.mxu1 %v4460_v19 }
 0x1b4   :  { %3433 = vmatprep.subr.bf16.mxu0 %v4383_v23  ;;  %3465 = vmatprep.subr.bf16.mxu1 %v4463_v20 }
 0x1b7   :  { %3435 = vmatpush1.bf16.msra.mxu0 %v4392_v29  ;;  %3467 = vmatpush1.bf16.msra.mxu1 %v4466_v27 }
 0x1b8   :  { %3437 = vmatprep.subr.bf16.mxu0 %v4395_v31  ;;  %3469 = vmatprep.subr.bf16.mxu1 %v4469_v28 }
 0x1bb   :  { %3439 = vmatpush1.bf16.msra.mxu0 %v4404_v38  ;;  %3471 = vmatpush1.bf16.msra.mxu1 %v4472_v35 }
 0x1bc   :  { %3505 = vmatprep.subr.bf16.mxu1 %v4407_v39 }
 0x271   :  { %v868_v30 = vpop.f32.mrb[2].mxu0  ;;  %v939_v34 = vpop.f32.mrb[2].mxu1 }
 0x272   :  { %v3828_v47 = vadd.f32 %v868_v30, %v4502_v48  ;;  %v870_v50 = vpop.f32.mrb[3].mxu0  ;;  %v941_v59 = vpop.f32.mrb[3].mxu1  ;;  %v3844_v22 = vadd.f32 %v939_v34, %v4510_v15  ;;  %v1265_v30 = vld [vmem:[#allocation11 + $0x168] sm:$0xff]  ;;  %v1260_v34 = vld [vmem:[#allocation11 + $0x140] sm:$0xff] }
 0x273   :  { %v3829_v60 = vadd.f32 %v870_v50, %v4504_v49  ;;  %v3845_v14 = vadd.f32 %v941_v59, %v4512_v17  ;;  %v1264_v50 = vld [vmem:[#allocation11 + $0x160] sm:$0xff]  ;;  %v1269_v59 = vld [vmem:[#allocation11 + $0x188] sm:$0xff] }
 0x274   :  { %v3142_v4 = vmul.f32 -1.442695, %v3828_v47  ;;  %v4615_v47 = vpack.c.bf16 %v1265_v30, %v1261_v54  ;;  %v1463_v30 = vld [vmem:[#allocation11 + $0x10] sm:$0xff] }
 0x275   :  { %v3143_v6 = vmul.f32 -1.442695, %v3829_v60  ;;  %v3144_v16 = vmul.f32 -1.442695, %v3845_v14  ;;  %v1273_v60 = vld [vmem:[#allocation11 + $0x1a8] sm:$0xff]  ;;  %v1268_v14 = vld [vmem:[#allocation11 + $0x180] sm:$0xff] }
 0x276   :  { %3917 = vpow2.f32 %v3142_v4  ;;  %v4617_v4 = vpack.c.bf16 %v1264_v50, %v1260_v34  ;;  %v1467_v34 = vld [vmem:[#allocation11 + $0x30] sm:$0xff] }
 0x277   :  { %3919 = vpow2.f32 %v3143_v6  ;;  %v4619_v6 = vpack.c.bf16 %v1273_v60, %v1269_v59  ;;  %v4666_v50 = vpack.c.bf16 %v1467_v34, %v1463_v30  ;;  %v1472_v59 = vld [vmem:[#allocation11 + $0x58] sm:$0xff]  ;;  %v1515_v30 = vld [vmem:[#allocation11 + $0x1b0] sm:$0xff] }
 0x278   :  { %3921 = vpow2.f32 %v3144_v16  ;;  %v1272_v16 = vld [vmem:[#allocation11 + $0x1a0] sm:$0xff]  ;;  %v1476_v60 = vld [vmem:[#allocation11 + $0x78] sm:$0xff] }
 0x279   :  { %3923 = vtanh.f32 %v3844_v22  ;;  %v1277_v22 = vld [vmem:[#allocation11 + $0x1c8] sm:$0xff]  ;;  %v1520_v34 = vld [vmem:[#allocation11 + $0x1d8] sm:$0xff] }
 0x280   :  { %v3918_v23 = vpop.eup %3917 }
 0x281   :  { %v3920_v29 = vpop.eup %3919  ;;  %v951_v31 = vadd.f32 1.0, %v3918_v23  ;;  %v1281_v23 = vld [vmem:[#allocation11 + $0x1e8] sm:$0xff] }
 0x282   :  { %v957_v38 = vadd.f32 1.0, %v3920_v29  ;;  %v3922_v39 = vpop.eup %3921  ;;  %v4623_v29 = vpack.c.bf16 %v1272_v16, %v1268_v14  ;;  %v4670_v14 = vpack.c.bf16 %v1476_v60, %v1472_v59  ;;  %v1471_v16 = vld [vmem:[#allocation11 + $0x50] sm:$0xff]  ;;  %v1524_v59 = vld [vmem:[#allocation11 + $0x1f8] sm:$0xff] }
 0x283   :  { %3925 = vrcp.f32 %v951_v31  ;;  %v3924_v56 = vpop.eup %3923  ;;  %v964_v0 = vadd.f32 1.0, %v3922_v39  ;;  %v4626_v31 = vpack.c.bf16 %v1281_v23, %v1277_v22  ;;  %v1280_v39 = vld [vmem:[#allocation11 + $0x1e0] sm:$0xff]  ;;  %v1475_v22 = vld [vmem:[#allocation11 + $0x70] sm:$0xff] }
 0x284   :  { %3927 = vrcp.f32 %v957_v38  ;;  %v1276_v38 = vld [vmem:[#allocation11 + $0x1c0] sm:$0xff]  ;;  %v4672_v23 = vpack.c.bf16 %v1475_v22, %v1471_v16  ;;  %v4705_v16 = vpack.c.bf16 %v1524_v59, %v1520_v34  ;;  %v1519_v22 = vld [vmem:[#allocation11 + $0x1d0] sm:$0xff] }
 0x285   :  { %3929 = vrcp.f32 %v964_v0 }
 0x28d   :  { %v3926_v57 = vpop.eup %3925 }
 0x28e   :  { %v3928_v62 = vpop.eup %3927  ;;  %v968_v63 = vmul.f32 %v3926_v57, %v3924_v56  ;;  %v4629_v56 = vpack.c.bf16 %v1280_v39, %v1276_v38  ;;  %v1480_v38 = vld [vmem:[#allocation11 + $0x98] sm:$0xff] }
 0x28f   :  { %v967_v1 = vmul.f32 %v3928_v62, %v4516_v46  ;;  %v3930_v8 = vpop.eup %3929  ;;  %v1252_v46 = vld [vmem:[#allocation11 + $0x100] sm:$0xff]  ;;  %v1484_v39 = vld [vmem:[#allocation11 + $0xb8] sm:$0xff] }
 0x290   :  { %v4611_v51 = vpack.c.bf16 %v1256_v43, %v1252_v46  ;;  %v1468_v43 = vld [vmem:[#allocation11 + $0x38] sm:$0xff] }
 0x291   :  { %v4561_v5 = vadd.f32 %v968_v63, %v967_v1 }
 0x293   :  { %3931 = vtanh.f32 %v4561_v5 }
 0x29d   :  { %v3932_v9 = vpop.eup %3931 }
 0x29e   :  { %v4564_v10 = vmul.f32 %v3932_v9, %v3930_v8 }
 0x2a0   :  { %1108 = vmatmul.mubr.f32.vlgmr.msra.gmra.mrb[4].mxu0 %v4564_v10  ;;  %1179 = vmatmul.mubr.f32.vlgmr.msra.gmra.mrb[4].mxu1 %v4564_v10 }
 0x2a1   :  { %3507 = vmatpush1.bf16.msra.mxu1 %v4416_v44  ;;  %1348 = vmatprep.mubr.f32.mxu0 %v4146_v7  ;;  %v1221_v44 = vld [vmem:[#allocation11 + $0x8] sm:$0xff] }
 0x2a2   :  { %3509 = vmatprep.subr.bf16.mxu1 %v4419_v45  ;;  %1419 = vmatprep.mubr.f32.mxu1 %v4146_v7  ;;  %v1225_v45 = vld [vmem:[#allocation11 + $0x28] sm:$0xff] }
 0x2a5   :  { %3511 = vmatpush1.bf16.msra.mxu1 %v4427_v52  ;;  %v4585_v52 = vpack.c.bf16 %v1225_v45, %v1221_v44 }
 0x2a6   :  { %3513 = vmatprep.subr.bf16.mxu1 %v4431_v53  ;;  %v1220_v53 = vld [vmem:[#allocation11] sm:$0xff] }
 0x2a7   :  { %3473 = vmatprep.subr.bf16.mxu0 %v4585_v52 }
 0x2a9   :  { %3515 = vmatpush1.bf16.msra.mxu1 %v4438_v58  ;;  %v1224_v58 = vld [vmem:[#allocation11 + $0x20] sm:$0xff] }
 0x2aa   :  { %3517 = vmatprep.subr.bf16.mxu1 %v4441_v61  ;;  %v4587_v61 = vpack.c.bf16 %v1224_v58, %v1220_v53 }
 0x2ac   :  { %3475 = vmatpush1.bf16.msra.mxu0 %v4587_v61 }
 0x2ad   :  { %3519 = vmatpush1.bf16.msra.mxu1 %v4448_v2  ;;  %v1229_v2 = vld [vmem:[#allocation11 + $0x48] sm:$0xff] }
 0x2ae   :  { %3521 = vmatprep.subr.bf16.mxu1 %v4451_v3  ;;  %v1233_v3 = vld [vmem:[#allocation11 + $0x68] sm:$0xff] }
 0x2b1   :  { %3523 = vmatpush1.bf16.msra.mxu1 %v4454_v11  ;;  %v4591_v11 = vpack.c.bf16 %v1233_v3, %v1229_v2 }
 0x2b2   :  { %3525 = vmatprep.subr.bf16.mxu1 %v4457_v12  ;;  %v1228_v12 = vld [vmem:[#allocation11 + $0x40] sm:$0xff] }
 0x2b3   :  { %3477 = vmatprep.subr.bf16.mxu0 %v4591_v11 }
 0x2b5   :  { %3527 = vmatpush1.bf16.msra.mxu1 %v4460_v19  ;;  %v1232_v19 = vld [vmem:[#allocation11 + $0x60] sm:$0xff] }
 0x2b6   :  { %3529 = vmatprep.subr.bf16.mxu1 %v4463_v20  ;;  %v4593_v20 = vpack.c.bf16 %v1232_v19, %v1228_v12 }
 0x2b8   :  { %3479 = vmatpush1.bf16.msra.mxu0 %v4593_v20 }
 0x2b9   :  { %3531 = vmatpush1.bf16.msra.mxu1 %v4466_v27  ;;  %v1237_v27 = vld [vmem:[#allocation11 + $0x88] sm:$0xff] }
 0x2ba   :  { %3533 = vmatprep.subr.bf16.mxu1 %v4469_v28  ;;  %v1241_v28 = vld [vmem:[#allocation11 + $0xa8] sm:$0xff] }
 0x2bd   :  { %3535 = vmatpush1.bf16.msra.mxu1 %v4472_v35  ;;  %v4597_v35 = vpack.c.bf16 %v1241_v28, %v1237_v27 }
 0x2bf   :  { %3481 = vmatprep.subr.bf16.mxu0 %v4597_v35 }
 0x2c0   :  { %3483 = vmatpush1.bf16.msra.mxu0 %v4599_v21 }
 0x2c1   :  { %3485 = vmatprep.subr.bf16.mxu0 %v4603_v26 }
 0x2c4   :  { %3487 = vmatpush1.bf16.msra.mxu0 %v4605_v36 }
 0x2c5   :  { %3489 = vmatprep.subr.bf16.mxu0 %v4609_v42 }
 0x2c8   :  { %3491 = vmatpush1.bf16.msra.mxu0 %v4611_v51 }
 0x2c9   :  { %3493 = vmatprep.subr.bf16.mxu0 %v4615_v47 }
 0x2cc   :  { %3495 = vmatpush1.bf16.msra.mxu0 %v4617_v4 }
 0x2cd   :  { %3497 = vmatprep.subr.bf16.mxu0 %v4619_v6 }
 0x2d0   :  { %3499 = vmatpush1.bf16.msra.mxu0 %v4623_v29 }
 0x2d1   :  { %3501 = vmatprep.subr.bf16.mxu0 %v4626_v31 }
 0x2d4   :  { %3503 = vmatpush1.bf16.msra.mxu0 %v4629_v56 }
 0x2d5   :  { %3537 = vmatprep.subr.bf16.mxu0 %v4585_v52 }
 0x373   :  { %v1109_v57 = vpop.f32.mrb[4].mxu0  ;;  %v1180_v62 = vpop.f32.mrb[4].mxu1 }
 0x374   :  { %v3830_v63 = vadd.f32 %v1109_v57, %v4502_v48  ;;  %v1111_v0 = vpop.f32.mrb[5].mxu0  ;;  %v1182_v1 = vpop.f32.mrb[5].mxu1  ;;  %v3846_v58 = vadd.f32 %v1180_v62, %v4510_v15  ;;  %v4676_v57 = vpack.c.bf16 %v1484_v39, %v1480_v38  ;;  %v1479_v62 = vld [vmem:[#allocation11 + $0x90] sm:$0xff] }
 0x375   :  { %v3831_v8 = vadd.f32 %v1111_v0, %v4504_v49  ;;  %v3847_v45 = vadd.f32 %v1182_v1, %v4512_v17  ;;  %v1488_v1 = vld [vmem:[#allocation11 + $0xd8] sm:$0xff]  ;;  %v1523_v38 = vld [vmem:[#allocation11 + $0x1f0] sm:$0xff] }
 0x376   :  { %v3145_v9 = vmul.f32 -1.442695, %v3830_v63  ;;  %v1483_v63 = vld [vmem:[#allocation11 + $0xb0] sm:$0xff]  ;;  %v4708_v39 = vpack.c.bf16 %v1523_v38, %v1519_v22 }
 0x377   :  { %v3146_v44 = vmul.f32 -1.442695, %v3831_v8  ;;  %v3147_v53 = vmul.f32 -1.442695, %v3847_v45  ;;  %v4678_v0 = vpack.c.bf16 %v1483_v63, %v1479_v62  ;;  %v1492_v8 = vld [vmem:[#allocation11 + $0xf8] sm:$0xff]  ;;  %v1491_v45 = vld [vmem:[#allocation11 + $0xf0] sm:$0xff] }
 0x378   :  { %3933 = vpow2.f32 %v3145_v9  ;;  %v4682_v9 = vpack.c.bf16 %v1492_v8, %v1488_v1 }
 0x379   :  { %3935 = vpow2.f32 %v3146_v44  ;;  %v1487_v44 = vld [vmem:[#allocation11 + $0xd0] sm:$0xff] }
 0x37a   :  { %3937 = vpow2.f32 %v3147_v53  ;;  %v4684_v53 = vpack.c.bf16 %v1491_v45, %v1487_v44 }
 0x37b   :  { %3939 = vtanh.f32 %v3846_v58  ;;  %v1496_v58 = vld [vmem:[#allocation11 + $0x118] sm:$0xff] }
 0x382   :  { %v3934_v2 = vpop.eup %3933 }
 0x383   :  { %v3936_v3 = vpop.eup %3935  ;;  %v1192_v12 = vadd.f32 1.0, %v3934_v2  ;;  %v1500_v2 = vld [vmem:[#allocation11 + $0x138] sm:$0xff] }
 0x384   :  { %v1198_v19 = vadd.f32 1.0, %v3936_v3  ;;  %v3938_v27 = vpop.eup %3937  ;;  %v4688_v3 = vpack.c.bf16 %v1500_v2, %v1496_v58 }
 0x385   :  { %3941 = vrcp.f32 %v1192_v12  ;;  %v3940_v28 = vpop.eup %3939  ;;  %v1205_v25 = vadd.f32 1.0, %v3938_v27  ;;  %v1495_v12 = vld [vmem:[#allocation11 + $0x110] sm:$0xff] }
 0x386   :  { %3943 = vrcp.f32 %v1198_v19  ;;  %v1499_v19 = vld [vmem:[#allocation11 + $0x130] sm:$0xff] }
 0x387   :  { %3945 = vrcp.f32 %v1205_v25  ;;  %v4690_v27 = vpack.c.bf16 %v1499_v19, %v1495_v12  ;;  %v1507_v25 = vld [vmem:[#allocation11 + $0x170] sm:$0xff] }
 0x38f   :  { %v3942_v13 = vpop.eup %3941 }
 0x390   :  { %v3944_v18 = vpop.eup %3943  ;;  %v1209_v24 = vmul.f32 %v3942_v13, %v3940_v28  ;;  %v1504_v28 = vld [vmem:[#allocation11 + $0x158] sm:$0xff] }
 0x391   :  { %v1208_v32 = vmul.f32 %v3944_v18, %v4561_v5  ;;  %v3946_v37 = vpop.eup %3945  ;;  %v1464_v5 = vld [vmem:[#allocation11 + $0x18] sm:$0xff]  ;;  %v1503_v18 = vld [vmem:[#allocation11 + $0x150] sm:$0xff] }
 0x392   :  { %v4664_v54 = vpack.c.bf16 %v1468_v43, %v1464_v5  ;;  %v1508_v13 = vld [vmem:[#allocation11 + $0x178] sm:$0xff]  ;;  %v1511_v43 = vld [vmem:[#allocation11 + $0x190] sm:$0xff] }
 0x393   :  { %v4639_v33 = vadd.f32 %v1209_v24, %v1208_v32  ;;  %v4694_v24 = vpack.c.bf16 %v1508_v13, %v1504_v28  ;;  %v1512_v32 = vld [vmem:[#allocation11 + $0x198] sm:$0xff]  ;;  %v4702_v60 = vpack.c.bf16 %v1515_v30, %v1511_v43 }
 0x394   :  { %3569 = vmatprep.subr.bf16.mxu1 %v4664_v54 }
 0x395   :  { %3947 = vtanh.f32 %v4639_v33 }
 0x39f   :  { %v3948_v40 = vpop.eup %3947 }
 0x3a0   :  { %v4642_v46 = vmul.f32 %v3948_v40, %v3946_v37  ;;  %v1516_v37 = vld [vmem:[#allocation11 + $0x1b8] sm:$0xff]  ;;  %v4696_v40 = vpack.c.bf16 %v1507_v25, %v1503_v18 }
 0x3a1   :  { %v4698_v5 = vpack.c.bf16 %v1516_v37, %v1512_v32 }
 0x3a2   :  { %1349 = vmatmul.mubr.f32.vlgmr.msra.gmra.mrb[6].mxu0 %v4642_v46  ;;  %1420 = vmatmul.mubr.f32.vlgmr.msra.gmra.mrb[6].mxu1 %v4642_v46 }
 0x3a3   :  { %3539 = vmatpush1.bf16.msra.mxu0 %v4587_v61  ;;  %1589 = vmatprep.mubr.f32.mxu0 %v4146_v7 }
 0x3a4   :  { %3541 = vmatprep.subr.bf16.mxu0 %v4591_v11  ;;  %1660 = vmatprep.mubr.f32.mxu1 %v4146_v7 }
 0x3a5   :  { %3571 = vmatpush1.bf16.msra.mxu1 %v4666_v50 }
 0x3a6   :  { %3573 = vmatprep.subr.bf16.mxu1 %v4670_v14 }
 0x3a7   :  { %3543 = vmatpush1.bf16.msra.mxu0 %v4593_v20 }
 0x3a8   :  { %3545 = vmatprep.subr.bf16.mxu0 %v4597_v35 }
 0x3a9   :  { %3575 = vmatpush1.bf16.msra.mxu1 %v4672_v23 }
 0x3aa   :  { %3577 = vmatprep.subr.bf16.mxu1 %v4676_v57 }
 0x3ab   :  { %3547 = vmatpush1.bf16.msra.mxu0 %v4599_v21 }
 0x3ac   :  { %3549 = vmatprep.subr.bf16.mxu0 %v4603_v26 }
 0x3ad   :  { %3579 = vmatpush1.bf16.msra.mxu1 %v4678_v0 }
 0x3ae   :  { %3581 = vmatprep.subr.bf16.mxu1 %v4682_v9 }
 0x3af   :  { %3551 = vmatpush1.bf16.msra.mxu0 %v4605_v36 }
 0x3b0   :  { %3553 = vmatprep.subr.bf16.mxu0 %v4609_v42 }
 0x3b1   :  { %3583 = vmatpush1.bf16.msra.mxu1 %v4684_v53 }
 0x3b2   :  { %3585 = vmatprep.subr.bf16.mxu1 %v4688_v3 }
 0x3b3   :  { %3555 = vmatpush1.bf16.msra.mxu0 %v4611_v51 }
 0x3b4   :  { %3557 = vmatprep.subr.bf16.mxu0 %v4615_v47 }
 0x3b5   :  { %3587 = vmatpush1.bf16.msra.mxu1 %v4690_v27 }
 0x3b6   :  { %3589 = vmatprep.subr.bf16.mxu1 %v4694_v24 }
 0x3b7   :  { %3559 = vmatpush1.bf16.msra.mxu0 %v4617_v4 }
 0x3b8   :  { %3561 = vmatprep.subr.bf16.mxu0 %v4619_v6 }
 0x3b9   :  { %3591 = vmatpush1.bf16.msra.mxu1 %v4696_v40 }
 0x3ba   :  { %3593 = vmatprep.subr.bf16.mxu1 %v4698_v5 }
 0x3bb   :  { %3563 = vmatpush1.bf16.msra.mxu0 %v4623_v29 }
 0x3bc   :  { %3565 = vmatprep.subr.bf16.mxu0 %v4626_v31 }
 0x3bd   :  { %3595 = vmatpush1.bf16.msra.mxu1 %v4702_v60 }
 0x3be   :  { %3597 = vmatprep.subr.bf16.mxu1 %v4705_v16 }
 0x3bf   :  { %3567 = vmatpush1.bf16.msra.mxu0 %v4629_v56 }
 0x3c0   :  { %3601 = vmatprep.subr.bf16.mxu0 %v4585_v52 }
 0x3c1   :  { %3599 = vmatpush1.bf16.msra.mxu1 %v4708_v39 }
 0x3c2   :  { %3633 = vmatprep.subr.bf16.mxu1 %v4664_v54 }
 0x475   :  { %v1350_v62 = vpop.f32.mrb[6].mxu0  ;;  %v1421_v63 = vpop.f32.mrb[6].mxu1 }
 0x476   :  { %v3832_v1 = vadd.f32 %v1350_v62, %v4502_v48  ;;  %v1352_v8 = vpop.f32.mrb[7].mxu0  ;;  %v1423_v44 = vpop.f32.mrb[7].mxu1  ;;  %v3848_v28 = vadd.f32 %v1421_v63, %v4510_v15 }
 0x477   :  { %v3833_v45 = vadd.f32 %v1352_v8, %v4504_v49  ;;  %v3849_v12 = vadd.f32 %v1423_v44, %v4512_v17 }
 0x478   :  { %v3148_v58 = vmul.f32 -1.442695, %v3832_v1 }
 0x479   :  { %v3149_v2 = vmul.f32 -1.442695, %v3833_v45  ;;  %v3150_v19 = vmul.f32 -1.442695, %v3849_v12 }
 0x47a   :  { %3949 = vpow2.f32 %v3148_v58 }
 0x47b   :  { %3951 = vpow2.f32 %v3149_v2 }
 0x47c   :  { %3953 = vpow2.f32 %v3150_v19 }
 0x47d   :  { %3955 = vtanh.f32 %v3848_v28 }
 0x484   :  { %v3950_v13 = vpop.eup %3949 }
 0x485   :  { %v3952_v18 = vpop.eup %3951  ;;  %v1433_v25 = vadd.f32 1.0, %v3950_v13 }
 0x486   :  { %v1439_v32 = vadd.f32 1.0, %v3952_v18  ;;  %v3954_v37 = vpop.eup %3953 }
 0x487   :  { %3957 = vrcp.f32 %v1433_v25  ;;  %v3956_v43 = vpop.eup %3955  ;;  %v1446_v22 = vadd.f32 1.0, %v3954_v37 }
 0x488   :  { %3959 = vrcp.f32 %v1439_v32 }
 0x489   :  { %3961 = vrcp.f32 %v1446_v22 }
 0x491   :  { %v3958_v30 = vpop.eup %3957 }
 0x492   :  { %v3960_v34 = vpop.eup %3959  ;;  %v1450_v59 = vmul.f32 %v3958_v30, %v3956_v43 }
 0x493   :  { %v1449_v38 = vmul.f32 %v3960_v34, %v4639_v33  ;;  %v3962_v63 = vpop.eup %3961 }
 0x495   :  { %v4718_v62 = vadd.f32 %v1450_v59, %v1449_v38 }
 0x497   :  { %3963 = vtanh.f32 %v4718_v62 }
 0x4a1   :  { %v3964_v1 = vpop.eup %3963 }
 0x4a2   :  { %v4721_v8 = vmul.f32 %v3964_v1, %v3962_v63 }
 0x4a4   :  { %1590 = vmatmul.mubr.f32.vlgmr.msra.gmra.mrb[8].mxu0 %v4721_v8  ;;  %1661 = vmatmul.mubr.f32.vlgmr.msra.gmra.mrb[8].mxu1 %v4721_v8 }
 0x4a5   :  { %3603 = vmatpush1.bf16.msra.mxu0 %v4587_v61  ;;  %3635 = vmatpush1.bf16.msra.mxu1 %v4666_v50 }
 0x4a6   :  { %3605 = vmatprep.subr.bf16.mxu0 %v4591_v11  ;;  %3637 = vmatprep.subr.bf16.mxu1 %v4670_v14 }
 0x4a7   :  { %1830 = vmatprep.mubr.f32.mxu0 %v4146_v7  ;;  %1901 = vmatprep.mubr.f32.mxu1 %v4146_v7 }
 0x4a9   :  { %3607 = vmatpush1.bf16.msra.mxu0 %v4593_v20  ;;  %3639 = vmatpush1.bf16.msra.mxu1 %v4672_v23 }
 0x4aa   :  { %3609 = vmatprep.subr.bf16.mxu0 %v4597_v35  ;;  %3641 = vmatprep.subr.bf16.mxu1 %v4676_v57 }
 0x4ad   :  { %3611 = vmatpush1.bf16.msra.mxu0 %v4599_v21  ;;  %3643 = vmatpush1.bf16.msra.mxu1 %v4678_v0 }
 0x4ae   :  { %3613 = vmatprep.subr.bf16.mxu0 %v4603_v26  ;;  %3645 = vmatprep.subr.bf16.mxu1 %v4682_v9 }
 0x4b1   :  { %3615 = vmatpush1.bf16.msra.mxu0 %v4605_v36  ;;  %3647 = vmatpush1.bf16.msra.mxu1 %v4684_v53 }
 0x4b2   :  { %3617 = vmatprep.subr.bf16.mxu0 %v4609_v42  ;;  %3649 = vmatprep.subr.bf16.mxu1 %v4688_v3 }
 0x4b5   :  { %3619 = vmatpush1.bf16.msra.mxu0 %v4611_v51  ;;  %3651 = vmatpush1.bf16.msra.mxu1 %v4690_v27 }
 0x4b6   :  { %3621 = vmatprep.subr.bf16.mxu0 %v4615_v47  ;;  %3653 = vmatprep.subr.bf16.mxu1 %v4694_v24 }
 0x4b9   :  { %3623 = vmatpush1.bf16.msra.mxu0 %v4617_v4  ;;  %3655 = vmatpush1.bf16.msra.mxu1 %v4696_v40 }
 0x4ba   :  { %3625 = vmatprep.subr.bf16.mxu0 %v4619_v6  ;;  %3657 = vmatprep.subr.bf16.mxu1 %v4698_v5 }
 0x4bd   :  { %3627 = vmatpush1.bf16.msra.mxu0 %v4623_v29  ;;  %3659 = vmatpush1.bf16.msra.mxu1 %v4702_v60 }
 0x4be   :  { %3629 = vmatprep.subr.bf16.mxu0 %v4626_v31  ;;  %3661 = vmatprep.subr.bf16.mxu1 %v4705_v16 }
 0x4c1   :  { %3631 = vmatpush1.bf16.msra.mxu0 %v4629_v56  ;;  %3663 = vmatpush1.bf16.msra.mxu1 %v4708_v39 }
 0x4c2   :  { %3665 = vmatprep.subr.bf16.mxu0 %v4585_v52  ;;  %3697 = vmatprep.subr.bf16.mxu1 %v4664_v54 }
 0x577   :  { %v1591_v33 = vpop.f32.mrb[8].mxu0  ;;  %v1662_v44 = vpop.f32.mrb[8].mxu1 }
 0x578   :  { %v3834_v45 = vadd.f32 %v1591_v33, %v4502_v48  ;;  %v1593_v58 = vpop.f32.mrb[9].mxu0  ;;  %v1664_v2 = vpop.f32.mrb[9].mxu1  ;;  %v3850_v25 = vadd.f32 %v1662_v44, %v4510_v15 }
 0x579   :  { %v3835_v12 = vadd.f32 %v1593_v58, %v4504_v49  ;;  %v3851_v13 = vadd.f32 %v1664_v2, %v4512_v17 }
 0x57a   :  { %v3151_v19 = vmul.f32 -1.442695, %v3834_v45 }
 0x57b   :  { %v3152_v28 = vmul.f32 -1.442695, %v3835_v12  ;;  %v3153_v18 = vmul.f32 -1.442695, %v3851_v13 }
 0x57c   :  { %3965 = vpow2.f32 %v3151_v19 }
 0x57d   :  { %3967 = vpow2.f32 %v3152_v28 }
 0x57e   :  { %3969 = vpow2.f32 %v3153_v18 }
 0x57f   :  { %3971 = vtanh.f32 %v3850_v25 }
 0x586   :  { %v3966_v52 = vpop.eup %3965 }
 0x587   :  { %v3968_v32 = vpop.eup %3967  ;;  %v1674_v37 = vadd.f32 1.0, %v3966_v52 }
 0x588   :  { %v1680_v43 = vadd.f32 1.0, %v3968_v32  ;;  %v3970_v30 = vpop.eup %3969 }
 0x589   :  { %3973 = vrcp.f32 %v1674_v37  ;;  %v3972_v34 = vpop.eup %3971  ;;  %v1687_v63 = vadd.f32 1.0, %v3970_v30  ;;  %v2204_v37 = vld [vmem:[#allocation11 + $0xa0] sm:$0xff]  ;;  %v2209_v30 = vld [vmem:[#allocation11 + $0xc8] sm:$0xff] }
 0x58a   :  { %3975 = vrcp.f32 %v1680_v43 }
 0x58b   :  { %3977 = vrcp.f32 %v1687_v63 }
 0x593   :  { %v3974_v59 = vpop.eup %3973 }
 0x594   :  { %v3976_v22 = vpop.eup %3975  ;;  %v1691_v38 = vmul.f32 %v3974_v59, %v3972_v34  ;;  %v2213_v34 = vld [vmem:[#allocation11 + $0xe8] sm:$0xff] }
 0x595   :  { %v1690_v1 = vmul.f32 %v3976_v22, %v4718_v62  ;;  %v3978_v44 = vpop.eup %3977  ;;  %v3740_v59 = vpack.c.bf16 %v2213_v34, %v2209_v30  ;;  %v2208_v22 = vld [vmem:[#allocation11 + $0xc0] sm:$0xff] }
 0x597   :  { %v4764_v33 = vadd.f32 %v1691_v38, %v1690_v1  ;;  %v2212_v38 = vld [vmem:[#allocation11 + $0xe0] sm:$0xff]  ;;  %v2217_v1 = vld [vmem:[#allocation11 + $0x108] sm:$0xff] }
 0x598   :  { %v3742_v63 = vpack.c.bf16 %v2212_v38, %v2208_v22  ;;  %v2430_v38 = vld [vmem:[#allocation12 + $0x10] sm:$0xff] }
 0x599   :  { %3979 = vtanh.f32 %v4764_v33 }
 0x5a3   :  { %v3980_v45 = vpop.eup %3979 }
 0x5a4   :  { %v4767_v58 = vmul.f32 %v3980_v45, %v3978_v44  ;;  %v2216_v45 = vld [vmem:[#allocation11 + $0x100] sm:$0xff] }
 0x5a6   :  { %1831 = vmatmul.mubr.f32.vlgmr.msra.gmra.mrb[10].mxu0 %v4767_v58  ;;  %1902 = vmatmul.mubr.f32.vlgmr.msra.gmra.mrb[10].mxu1 %v4767_v58 }
 0x5a7   :  { %3667 = vmatpush1.bf16.msra.mxu0 %v4587_v61  ;;  %3699 = vmatpush1.bf16.msra.mxu1 %v4666_v50 }
 0x5a8   :  { %3669 = vmatprep.subr.bf16.mxu0 %v4591_v11  ;;  %3701 = vmatprep.subr.bf16.mxu1 %v4670_v14 }
 0x5a9   :  { %2071 = vmatprep.mubr.f32.mxu0 %v4146_v7  ;;  %2142 = vmatprep.mubr.f32.mxu1 %v4146_v7 }
 0x5ab   :  { %3671 = vmatpush1.bf16.msra.mxu0 %v4593_v20  ;;  %3703 = vmatpush1.bf16.msra.mxu1 %v4672_v23 }
 0x5ac   :  { %3673 = vmatprep.subr.bf16.mxu0 %v4597_v35  ;;  %3705 = vmatprep.subr.bf16.mxu1 %v4676_v57 }
 0x5af   :  { %3675 = vmatpush1.bf16.msra.mxu0 %v4599_v21  ;;  %3707 = vmatpush1.bf16.msra.mxu1 %v4678_v0 }
 0x5b0   :  { %3677 = vmatprep.subr.bf16.mxu0 %v4603_v26  ;;  %3709 = vmatprep.subr.bf16.mxu1 %v4682_v9 }
 0x5b3   :  { %3679 = vmatpush1.bf16.msra.mxu0 %v4605_v36  ;;  %3711 = vmatpush1.bf16.msra.mxu1 %v4684_v53 }
 0x5b4   :  { %3681 = vmatprep.subr.bf16.mxu0 %v4609_v42  ;;  %3713 = vmatprep.subr.bf16.mxu1 %v4688_v3 }
 0x5b7   :  { %3683 = vmatpush1.bf16.msra.mxu0 %v4611_v51  ;;  %3715 = vmatpush1.bf16.msra.mxu1 %v4690_v27 }
 0x5b8   :  { %3685 = vmatprep.subr.bf16.mxu0 %v4615_v47  ;;  %3717 = vmatprep.subr.bf16.mxu1 %v4694_v24 }
 0x5bb   :  { %3687 = vmatpush1.bf16.msra.mxu0 %v4617_v4  ;;  %3719 = vmatpush1.bf16.msra.mxu1 %v4696_v40 }
 0x5bc   :  { %3689 = vmatprep.subr.bf16.mxu0 %v4619_v6  ;;  %3721 = vmatprep.subr.bf16.mxu1 %v4698_v5 }
 0x5bf   :  { %3691 = vmatpush1.bf16.msra.mxu0 %v4623_v29  ;;  %3723 = vmatpush1.bf16.msra.mxu1 %v4702_v60 }
 0x5c0   :  { %3693 = vmatprep.subr.bf16.mxu0 %v4626_v31  ;;  %3725 = vmatprep.subr.bf16.mxu1 %v4705_v16 }
 0x5c3   :  { %3695 = vmatpush1.bf16.msra.mxu0 %v4629_v56  ;;  %3727 = vmatpush1.bf16.msra.mxu1 %v4708_v39 }
 0x5c4   :  { %3761 = vmatprep.subr.bf16.mxu1 %v4664_v54 }
 0x679   :  { %v1832_v61 = vpop.f32.mrb[10].mxu0  ;;  %v1903_v11 = vpop.f32.mrb[10].mxu1 }
 0x67a   :  { %v3836_v20 = vadd.f32 %v1832_v61, %v4502_v48  ;;  %v1834_v35 = vpop.f32.mrb[11].mxu0  ;;  %v1905_v21 = vpop.f32.mrb[11].mxu1  ;;  %v3852_v4 = vadd.f32 %v1903_v11, %v4510_v15  ;;  %v2220_v61 = vld [vmem:[#allocation11 + $0x120] sm:$0xff] }
 0x67b   :  { %v3837_v26 = vadd.f32 %v1834_v35, %v4504_v49  ;;  %v3853_v51 = vadd.f32 %v1905_v21, %v4512_v17  ;;  %v3746_v11 = vpack.c.bf16 %v2220_v61, %v2216_v45  ;;  %v2229_v35 = vld [vmem:[#allocation11 + $0x168] sm:$0xff]  ;;  %v2224_v21 = vld [vmem:[#allocation11 + $0x140] sm:$0xff] }
 0x67c   :  { %v3154_v36 = vmul.f32 -1.442695, %v3836_v20  ;;  %v2225_v20 = vld [vmem:[#allocation11 + $0x148] sm:$0xff]  ;;  %v2432_v61 = vld [vmem:[#allocation12 + $0x20] sm:$0xff] }
 0x67d   :  { %v3155_v42 = vmul.f32 -1.442695, %v3837_v26  ;;  %v3156_v47 = vmul.f32 -1.442695, %v3853_v51  ;;  %v3748_v26 = vpack.c.bf16 %v2229_v35, %v2225_v20  ;;  %v2237_v51 = vld [vmem:[#allocation11 + $0x1a8] sm:$0xff]  ;;  %v2434_v20 = vld [vmem:[#allocation12 + $0x30] sm:$0xff] }
 0x67e   :  { %3981 = vpow2.f32 %v3154_v36  ;;  %v2228_v36 = vld [vmem:[#allocation11 + $0x160] sm:$0xff]  ;;  %v2435_v35 = vld [vmem:[#allocation12 + $0x38] sm:$0xff] }
 0x67f   :  { %3983 = vpow2.f32 %v3155_v42  ;;  %v2233_v42 = vld [vmem:[#allocation11 + $0x188] sm:$0xff] }
 0x680   :  { %3985 = vpow2.f32 %v3156_v47  ;;  %v3750_v47 = vpack.c.bf16 %v2228_v36, %v2224_v21  ;;  %v3804_v21 = vpack.c.bf16 %v2435_v35, %v2434_v20  ;;  %v2437_v36 = vld [vmem:[#allocation12 + $0x48] sm:$0xff] }
 0x681   :  { %3987 = vtanh.f32 %v3852_v4  ;;  %v3752_v4 = vpack.c.bf16 %v2237_v51, %v2233_v42  ;;  %v2438_v51 = vld [vmem:[#allocation12 + $0x50] sm:$0xff] }
 0x688   :  { %v3982_v6 = vpop.eup %3981 }
 0x689   :  { %v3984_v29 = vpop.eup %3983  ;;  %v1915_v31 = vadd.f32 1.0, %v3982_v6  ;;  %v2232_v6 = vld [vmem:[#allocation11 + $0x180] sm:$0xff] }
 0x68a   :  { %v1921_v56 = vadd.f32 1.0, %v3984_v29  ;;  %v3986_v54 = vpop.eup %3985  ;;  %v2236_v29 = vld [vmem:[#allocation11 + $0x1a0] sm:$0xff] }
 0x68b   :  { %3989 = vrcp.f32 %v1915_v31  ;;  %v3988_v62 = vpop.eup %3987  ;;  %v1928_v28 = vadd.f32 1.0, %v3986_v54  ;;  %v2241_v31 = vld [vmem:[#allocation11 + $0x1c8] sm:$0xff]  ;;  %v3754_v54 = vpack.c.bf16 %v2236_v29, %v2232_v6  ;;  %v2440_v6 = vld [vmem:[#allocation12 + $0x60] sm:$0xff] }
 0x68c   :  { %3991 = vrcp.f32 %v1921_v56  ;;  %v2245_v56 = vld [vmem:[#allocation11 + $0x1e8] sm:$0xff] }
 0x68d   :  { %3993 = vrcp.f32 %v1928_v28  ;;  %v2429_v28 = vld [vmem:[#allocation12 + $0x8] sm:$0xff] }
 0x68e   :  { %v2441_v29 = vld [vmem:[#allocation12 + $0x68] sm:$0xff] }
 0x695   :  { %v3990_v2 = vpop.eup %3989 }
 0x696   :  { %v3992_v12 = vpop.eup %3991  ;;  %v1932_v19 = vmul.f32 %v3990_v2, %v3988_v62  ;;  %v3756_v62 = vpack.c.bf16 %v2245_v56, %v2241_v31  ;;  %v2240_v2 = vld [vmem:[#allocation11 + $0x1c0] sm:$0xff]  ;;  %v2442_v31 = vld [vmem:[#allocation12 + $0x70] sm:$0xff]  ;;  %v2443_v56 = vld [vmem:[#allocation12 + $0x78] sm:$0xff] }
 0x697   :  { %v1931_v13 = vmul.f32 %v3992_v12, %v4764_v33  ;;  %v3994_v25 = vpop.eup %3993  ;;  %v2221_v33 = vld [vmem:[#allocation11 + $0x128] sm:$0xff]  ;;  %v2244_v12 = vld [vmem:[#allocation11 + $0x1e0] sm:$0xff] }
 0x698   :  { %v3744_v44 = vpack.c.bf16 %v2221_v33, %v2217_v1 }
 0x699   :  { %v4809_v18 = vadd.f32 %v1932_v19, %v1931_v13  ;;  %v2428_v19 = vld [vmem:[#allocation12] sm:$0xff]  ;;  %v3758_v13 = vpack.c.bf16 %v2244_v12, %v2240_v2 }
 0x69b   :  { %3995 = vtanh.f32 %v4809_v18 }
 0x6a5   :  { %v3996_v52 = vpop.eup %3995 }
 0x6a6   :  { %v4812_v32 = vmul.f32 %v3996_v52, %v3994_v25  ;;  %v3792_v25 = vpack.c.bf16 %v2429_v28, %v2428_v19 }
 0x6a8   :  { %2072 = vmatmul.mubr.f32.vlgmr.msra.gmra.mrb[12].mxu0 %v4812_v32  ;;  %2143 = vmatmul.mubr.f32.vlgmr.msra.gmra.mrb[12].mxu1 %v4812_v32 }
 0x6a9   :  { %3763 = vmatpush1.bf16.msra.mxu1 %v4666_v50  ;;  %2312 = vmatprep.mubr.f32.mxu0 %v4146_v7  ;;  %v2189_v50 = vld [vmem:[#allocation11 + $0x28] sm:$0xff] }
 0x6aa   :  { %3765 = vmatprep.subr.bf16.mxu1 %v4670_v14  ;;  %2383 = vmatprep.mubr.f32.mxu1 %v4146_v7  ;;  %v2185_v7 = vld [vmem:[#allocation11 + $0x8] sm:$0xff] }
 0x6ab   :  { %v3728_v14 = vpack.c.bf16 %v2189_v50, %v2185_v7 }
 0x6ad   :  { %3767 = vmatpush1.bf16.msra.mxu1 %v4672_v23  ;;  %v2184_v23 = vld [vmem:[#allocation11] sm:$0xff]  ;;  %3729 = vmatprep.subr.bf16.mxu0 %v3728_v14 }
 0x6ae   :  { %3769 = vmatprep.subr.bf16.mxu1 %v4676_v57  ;;  %v2188_v57 = vld [vmem:[#allocation11 + $0x20] sm:$0xff] }
 0x6b1   :  { %3771 = vmatpush1.bf16.msra.mxu1 %v4678_v0  ;;  %v3730_v0 = vpack.c.bf16 %v2188_v57, %v2184_v23 }
 0x6b2   :  { %3773 = vmatprep.subr.bf16.mxu1 %v4682_v9  ;;  %v2193_v9 = vld [vmem:[#allocation11 + $0x48] sm:$0xff] }
 0x6b3   :  { %3731 = vmatpush1.bf16.msra.mxu0 %v3730_v0 }
 0x6b5   :  { %3775 = vmatpush1.bf16.msra.mxu1 %v4684_v53  ;;  %v2197_v53 = vld [vmem:[#allocation11 + $0x68] sm:$0xff] }
 0x6b6   :  { %3777 = vmatprep.subr.bf16.mxu1 %v4688_v3  ;;  %v3732_v3 = vpack.c.bf16 %v2197_v53, %v2193_v9 }
 0x6b8   :  { %3733 = vmatprep.subr.bf16.mxu0 %v3732_v3 }
 0x6b9   :  { %3779 = vmatpush1.bf16.msra.mxu1 %v4690_v27  ;;  %v2192_v27 = vld [vmem:[#allocation11 + $0x40] sm:$0xff] }
 0x6ba   :  { %3781 = vmatprep.subr.bf16.mxu1 %v4694_v24  ;;  %v2196_v24 = vld [vmem:[#allocation11 + $0x60] sm:$0xff] }
 0x6bd   :  { %3783 = vmatpush1.bf16.msra.mxu1 %v4696_v40  ;;  %v3734_v40 = vpack.c.bf16 %v2196_v24, %v2192_v27 }
 0x6be   :  { %3785 = vmatprep.subr.bf16.mxu1 %v4698_v5  ;;  %v2201_v5 = vld [vmem:[#allocation11 + $0x88] sm:$0xff] }
 0x6bf   :  { %3735 = vmatpush1.bf16.msra.mxu0 %v3734_v40 }
 0x6c1   :  { %3787 = vmatpush1.bf16.msra.mxu1 %v4702_v60  ;;  %v2205_v60 = vld [vmem:[#allocation11 + $0xa8] sm:$0xff] }
 0x6c2   :  { %3789 = vmatprep.subr.bf16.mxu1 %v4705_v16  ;;  %v3736_v16 = vpack.c.bf16 %v2205_v60, %v2201_v5 }
 0x6c4   :  { %3737 = vmatprep.subr.bf16.mxu0 %v3736_v16 }
 0x6c5   :  { %3791 = vmatpush1.bf16.msra.mxu1 %v4708_v39  ;;  %v2200_v39 = vld [vmem:[#allocation11 + $0x80] sm:$0xff] }
 0x6c6   :  { %v3738_v43 = vpack.c.bf16 %v2204_v37, %v2200_v39 }
 0x6c8   :  { %3739 = vmatpush1.bf16.msra.mxu0 %v3738_v43 }
 0x6c9   :  { %3741 = vmatprep.subr.bf16.mxu0 %v3740_v59 }
 0x6cc   :  { %3743 = vmatpush1.bf16.msra.mxu0 %v3742_v63  ;;  %v2431_v63 = vld [vmem:[#allocation12 + $0x18] sm:$0xff] }
 0x6cd   :  { %3745 = vmatprep.subr.bf16.mxu0 %v3744_v44  ;;  %v3796_v45 = vpack.c.bf16 %v2431_v63, %v2430_v38 }
 0x6d0   :  { %3747 = vmatpush1.bf16.msra.mxu0 %v3746_v11  ;;  %v2433_v11 = vld [vmem:[#allocation12 + $0x28] sm:$0xff] }
 0x6d1   :  { %3749 = vmatprep.subr.bf16.mxu0 %v3748_v26  ;;  %v2436_v26 = vld [vmem:[#allocation12 + $0x40] sm:$0xff] }
 0x6d2   :  { %v3808_v42 = vpack.c.bf16 %v2437_v36, %v2436_v26 }
 0x6d4   :  { %3751 = vmatpush1.bf16.msra.mxu0 %v3750_v47  ;;  %v2439_v47 = vld [vmem:[#allocation12 + $0x58] sm:$0xff] }
 0x6d5   :  { %3753 = vmatprep.subr.bf16.mxu0 %v3752_v4  ;;  %v3812_v4 = vpack.c.bf16 %v2439_v47, %v2438_v51 }
 0x6d8   :  { %3755 = vmatpush1.bf16.msra.mxu0 %v3754_v54  ;;  %v3820_v54 = vpack.c.bf16 %v2443_v56, %v2442_v31 }
 0x6d9   :  { %3757 = vmatprep.subr.bf16.mxu0 %v3756_v62 }
 0x6dc   :  { %3759 = vmatpush1.bf16.msra.mxu0 %v3758_v13 }
 0x6dd   :  { %3793 = vmatprep.subr.bf16.mxu0 %v3792_v25 }
 0x77b   :  { %v2073_v52 = vpop.f32.mrb[12].mxu0  ;;  %v2144_v7 = vpop.f32.mrb[12].mxu1 }
 0x77c   :  { %v3838_v50 = vadd.f32 %v2073_v52, %v4502_v48  ;;  %v2075_v14 = vpop.f32.mrb[13].mxu0  ;;  %v2146_v23 = vpop.f32.mrb[13].mxu1  ;;  %v3854_v27 = vadd.f32 %v2144_v7, %v4510_v15 }
 0x77d   :  { %v3839_v57 = vadd.f32 %v2075_v14, %v4504_v49  ;;  %v3855_v53 = vadd.f32 %v2146_v23, %v4512_v17 }
 0x77e   :  { %v3157_v0 = vmul.f32 -1.442695, %v3838_v50 }
 0x77f   :  { %v3158_v9 = vmul.f32 -1.442695, %v3839_v57  ;;  %v3159_v3 = vmul.f32 -1.442695, %v3855_v53 }
 0x780   :  { %3997 = vpow2.f32 %v3157_v0 }
 0x781   :  { %3999 = vpow2.f32 %v3158_v9 }
 0x782   :  { %4001 = vpow2.f32 %v3159_v3 }
 0x783   :  { %4003 = vtanh.f32 %v3854_v27 }
 0x78a   :  { %v3998_v24 = vpop.eup %3997 }
 0x78b   :  { %v4000_v40 = vpop.eup %3999  ;;  %v2156_v5 = vadd.f32 1.0, %v3998_v24 }
 0x78c   :  { %v2162_v60 = vadd.f32 1.0, %v4000_v40  ;;  %v4002_v16 = vpop.eup %4001 }
 0x78d   :  { %4005 = vrcp.f32 %v2156_v5  ;;  %v4004_v39 = vpop.eup %4003  ;;  %v2169_v34 = vadd.f32 1.0, %v4002_v16 }
 0x78e   :  { %4007 = vrcp.f32 %v2162_v60 }
 0x78f   :  { %4009 = vrcp.f32 %v2169_v34 }
 0x797   :  { %v4006_v37 = vpop.eup %4005 }
 0x798   :  { %v4008_v43 = vpop.eup %4007  ;;  %v2173_v30 = vmul.f32 %v4006_v37, %v4004_v39 }
 0x799   :  { %v2172_v59 = vmul.f32 %v4008_v43, %v4809_v18  ;;  %v4010_v1 = vpop.eup %4009  ;;  %v3800_v18 = vpack.c.bf16 %v2433_v11, %v2432_v61 }
 0x79b   :  { %v4838_v22 = vadd.f32 %v2173_v30, %v2172_v59 }
 0x79d   :  { %4011 = vtanh.f32 %v4838_v22 }
 0x7a7   :  { %v4012_v33 = vpop.eup %4011 }
 0x7a8   :  { %v2176_v44 = vmul.f32 %v4012_v33, %v4010_v1 }
 0x7aa   :  { %2313 = vmatmul.mubr.f32.vlgmr.msra.gmra.mrb[14].mxu0 %v2176_v44  ;;  %2384 = vmatmul.mubr.f32.vlgmr.msra.gmra.mrb[14].mxu1 %v2176_v44 }
 0x7ab   :  { %3795 = vmatpush3.bf16.msra.mxu0 %v3792_v25  ;;  %3252 = vmatprep.mubr.f32.mxu0 %v4519_v55  ;;  %v3816_v55 = vpack.c.bf16 %v2441_v29, %v2440_v6 }
 0x7ac   :  { %3797 = vmatprep.subr.bf16.mxu0 %v3796_v45 }
 0x7af   :  { %3799 = vmatpush3.bf16.msra.mxu0 %v3796_v45 }
 0x7b0   :  { %3801 = vmatprep.subr.bf16.mxu0 %v3800_v18 }
 0x7b3   :  { %3803 = vmatpush3.bf16.msra.mxu0 %v3800_v18 }
 0x7b4   :  { %3805 = vmatprep.subr.bf16.mxu0 %v3804_v21 }
 0x7b7   :  { %3807 = vmatpush3.bf16.msra.mxu0 %v3804_v21 }
 0x7b8   :  { %3809 = vmatprep.subr.bf16.mxu0 %v3808_v42 }
 0x7bb   :  { %3811 = vmatpush3.bf16.msra.mxu0 %v3808_v42 }
 0x7bc   :  { %3813 = vmatprep.subr.bf16.mxu0 %v3812_v4 }
 0x7bf   :  { %3815 = vmatpush3.bf16.msra.mxu0 %v3812_v4 }
 0x7c0   :  { %3817 = vmatprep.subr.bf16.mxu0 %v3816_v55 }
 0x7c3   :  { %3819 = vmatpush3.bf16.msra.mxu0 %v3816_v55 }
 0x7c4   :  { %3821 = vmatprep.subr.bf16.mxu0 %v3820_v54 }
 0x7c7   :  { %3823 = vmatpush3.bf16.msra.mxu0 %v3820_v54 }
 0x7ca   :  { %3253 = vmatmul.mubr.f32.vlgmr.msra.gmra.mrb[16].mxu0 %v4564_v10 }
 0x7cb   :  { %3255 = vmatprep.mubr.f32.mxu0 %v4642_v46 }
 0x7ce   :  { %3256 = vmatmul.mubr.f32.gmra.mrb[18].mxu0 %v4721_v8 }
 0x7cf   :  { %3258 = vmatprep.mubr.f32.mxu0 %v4767_v58 }
 0x7d2   :  { %3259 = vmatmul.mubr.f32.gmra.mrb[20].mxu0 %v4812_v32 }
 0x7d3   :  { %3261 = vmatprep.mubr.f32.mxu0 %v2176_v44 }
 0x87d   :  { %v2314_v62 = vpop.f32.mrb[14].mxu0  ;;  %v2385_v2 = vpop.f32.mrb[14].mxu1 }
 0x87e   :  { %v3840_v12 = vadd.f32 %v2314_v62, %v4502_v48  ;;  %v2316_v19 = vpop.f32.mrb[15].mxu0  ;;  %v2387_v28 = vpop.f32.mrb[15].mxu1  ;;  %v3856_v46 = vadd.f32 %v2385_v2, %v4510_v15  ;;  %v4147_v48 = vmov 1966171168   ;;  %v4855_v15 = vld [vmem:[%s5114_s6] ss:$0 sm:$0xff] }
 0x87f   :  { %v3841_v13 = vadd.f32 %v2316_v19, %v4504_v49  ;;  %v3857_v10 = vadd.f32 %v2387_v28, %v4512_v17  ;;  %v2559_v14 = vunpack.c.l.s4 %v4147_v48 }
 0x880   :  { %v3160_v25 = vmul.f32 -1.442695, %v3840_v12 }
 0x881   :  { %v3161_v52 = vmul.f32 -1.442695, %v3841_v13  ;;  %v3162_v8 = vmul.f32 -1.442695, %v3857_v10  ;;  %v2560_v57 = vunpack.c.0.s8 %v2559_v14 }
 0x882   :  { %4013 = vpow2.f32 %v3160_v25 }
 0x883   :  { %4015 = vpow2.f32 %v3161_v52  ;;  %v4858_v3 = vsub.s32 %v2560_v57, %v4495_v41 }
 0x884   :  { %4017 = vtanh.f32 %v3856_v46 }
 0x885   :  { %4019 = vpow2.f32 %v3162_v8 }
 0x88c   :  { %v4014_v58 = vpop.eup %4013 }
 0x88d   :  { %v4016_v32 = vpop.eup %4015  ;;  %v2397_v7 = vadd.f32 1.0, %v4014_v58 }
 0x88e   :  { %v2403_v50 = vadd.f32 1.0, %v4016_v32  ;;  %v4018_v49 = vpop.eup %4017 }
 0x88f   :  { %4021 = vrcp.f32 %v2397_v7  ;;  %v4020_v23 = vpop.eup %4019 }
 0x890   :  { %4023 = vrcp.f32 %v2403_v50  ;;  %v2410_v27 = vadd.f32 1.0, %v4020_v23 }
 0x892   :  { %4025 = vrcp.f32 %v2410_v27 }
 0x899   :  { %v4022_v0 = vpop.eup %4021 }
 0x89a   :  { %v4024_v9 = vpop.eup %4023  ;;  %v2414_v53 = vmul.f32 %v4022_v0, %v4018_v49 }
 0x89b   :  { %v2413_v17 = vmul.f32 %v4024_v9, %v4838_v22 }
 0x89c   :  { %v4026_v10 = vpop.eup %4025 }
 0x89d   :  { %v3254_v24 = vpop.f32.mrb[16].mxu0  ;;  %v2415_v40 = vadd.f32 %v2414_v53, %v2413_v17 }
 0x89e   :  { %v2523_v5 = vadd.f32 %v3254_v24, %v4855_v15  ;;  %v2517_v60 = vpop.f32.mrb[17].mxu0 }
 0x89f   :  { %v2518_v16 = vadd.f32 %v4855_v15, %v2517_v60  ;;  %4027 = vtanh.f32 %v2415_v40 }
 0x8a0   :  { %v2623_v39 = vcombine.high %v2523_v5, %v2523_v5  ;;  %v2630_v37 = vrot.slane %v2523_v5, %v4858_v3 }
 0x8a1   :  { %v2557_v43 = vcombine.high %v2518_v16, %v2518_v16  ;;  %v2564_v30 = vrot.slane %v2518_v16, %v4858_v3  ;;  %v3257_v34 = vpop.f32.mrb[18].mxu0 }
 0x8a2   :  { %v2637_v41 = vrot.slane %v2623_v39, %v4858_v3  ;;  %v2638_v59 = vcombine.high %v2630_v37, %v2630_v37  ;;  %v2646_v22 = vrot.slane %v2630_v37, %v4858_v3  ;;  %3168 = vst.sshfl [vmem:[%s5115_s7 + $0x1] sm:$0x1 pattern:$0x73625140] %v2630_v37  ;;  %v2533_v38 = vadd.f32 %v3257_v34, %v4855_v15  ;;  %v2527_v63 = vpop.f32.mrb[19].mxu0 }
 0x8a3   :  { %v2571_v1 = vrot.slane %v2557_v43, %v4858_v3  ;;  %v2572_v33 = vcombine.high %v2564_v30, %v2564_v30  ;;  %v2580_v44 = vrot.slane %v2564_v30, %v4858_v3  ;;  %3164 = vst.sshfl [vmem:[%s5115_s7] sm:$0x1 pattern:$0x73625140] %v2564_v30  ;;  %v2528_v45 = vadd.f32 %v4855_v15, %v2527_v63 }
 0x8a4   :  { %v2639_v61 = vcombine.high %v2637_v41, %v2637_v41  ;;  %v2653_v11 = vrot.slane %v2637_v41, %v4858_v3  ;;  %v2660_v18 = vrot.slane %v2638_v59, %v4858_v3  ;;  %v2668_v20 = vcombine.high %v2646_v22, %v2646_v22  ;;  %3169 = vst.sshfl [vmem:[%s5115_s7 + $0x9] sm:$0x1 pattern:$0x73625140] %v2638_v59 }
 0x8a5   :  { %3170 = vst.sshfl [vmem:[%s5115_s7 + $0x21] sm:$0x1 pattern:$0x73625140] %v2637_v41  ;;  %v2573_v35 = vcombine.high %v2571_v1, %v2571_v1  ;;  %v2587_v21 = vrot.slane %v2571_v1, %v4858_v3  ;;  %v2594_v26 = vrot.slane %v2572_v33, %v4858_v3  ;;  %v2602_v36 = vcombine.high %v2580_v44, %v2580_v44  ;;  %v3260_v42 = vpop.f32.mrb[20].mxu0 }
 0x8a6   :  { %3165 = vst.sshfl [vmem:[%s5115_s7 + $0x8] sm:$0x1 pattern:$0x73625140] %v2572_v33  ;;  %v2667_v51 = vrot.slane %v2639_v61, %v4858_v3  ;;  %v2669_v47 = vcombine.high %v2653_v11, %v2653_v11  ;;  %v2670_v4 = vcombine.high %v2660_v18, %v2660_v18  ;;  %2682 = vst [vmem:[%s5115_s7 + $0x11] sm:$0x1] %v2668_v20 }
 0x8a7   :  { %3166 = vst.sshfl [vmem:[%s5115_s7 + $0x20] sm:$0x1 pattern:$0x73625140] %v2571_v1  ;;  %v2755_v6 = vcombine.high %v2533_v38, %v2533_v38  ;;  %v2537_v29 = vpop.f32.mrb[21].mxu0  ;;  %v2601_v55 = vrot.slane %v2573_v35, %v4858_v3  ;;  %v2603_v31 = vcombine.high %v2587_v21, %v2587_v21  ;;  %v2604_v56 = vcombine.high %v2594_v26, %v2594_v26 }
 0x8a8   :  { %3171 = vst.sshfl [vmem:[%s5115_s7 + $0x29] sm:$0x1 pattern:$0x73625140] %v2639_v61  ;;  %2616 = vst [vmem:[%s5115_s7 + $0x10] sm:$0x1] %v2602_v36  ;;  %v2762_v54 = vrot.slane %v2533_v38, %v4858_v3  ;;  %v2671_v62 = vcombine.high %v2667_v51, %v2667_v51  ;;  %v2689_v12 = vcombine.high %v2528_v45, %v2528_v45 }
 0x8a9   :  { %3167 = vst.sshfl [vmem:[%s5115_s7 + $0x28] sm:$0x1 pattern:$0x73625140] %v2573_v35  ;;  %2683 = vst [vmem:[%s5115_s7 + $0x19] sm:$0x1] %v2670_v4  ;;  %v2769_v2 = vrot.slane %v2755_v6, %v4858_v3  ;;  %v2696_v19 = vrot.slane %v2528_v45, %v4858_v3  ;;  %v2605_v28 = vcombine.high %v2601_v55, %v2601_v55  ;;  %v4028_v7 = vpop.eup %4027 }
 0x8aa   :  { %2686 = vst [vmem:[%s5115_s7 + $0x31] sm:$0x1] %v2669_v47  ;;  %2617 = vst [vmem:[%s5115_s7 + $0x18] sm:$0x1] %v2604_v56  ;;  %v2770_v13 = vcombine.high %v2762_v54, %v2762_v54  ;;  %v2778_v25 = vrot.slane %v2762_v54, %v4858_v3  ;;  %v2543_v52 = vadd.f32 %v3260_v42, %v4855_v15 }
 0x8ab   :  { %2620 = vst [vmem:[%s5115_s7 + $0x30] sm:$0x1] %v2603_v31  ;;  %3176 = vst.sshfl [vmem:[%s5115_s7 + $0x3] sm:$0x1 pattern:$0x73625140] %v2762_v54  ;;  %v2771_v46 = vcombine.high %v2769_v2, %v2769_v2  ;;  %v2785_v8 = vrot.slane %v2769_v2, %v4858_v3  ;;  %v2703_v58 = vrot.slane %v2689_v12, %v4858_v3 }
 0x8ac   :  { %2687 = vst [vmem:[%s5115_s7 + $0x39] sm:$0x1] %v2671_v62  ;;  %3178 = vst.sshfl [vmem:[%s5115_s7 + $0x23] sm:$0x1 pattern:$0x73625140] %v2769_v2  ;;  %v2704_v32 = vcombine.high %v2696_v19, %v2696_v19  ;;  %v2792_v50 = vrot.slane %v2770_v13, %v4858_v3  ;;  %v2800_v48 = vcombine.high %v2778_v25, %v2778_v25 }
 0x8ad   :  { %3172 = vst.sshfl [vmem:[%s5115_s7 + $0x2] sm:$0x1 pattern:$0x73625140] %v2696_v19  ;;  %2621 = vst [vmem:[%s5115_s7 + $0x38] sm:$0x1] %v2605_v28  ;;  %v2712_v14 = vrot.slane %v2696_v19, %v4858_v3  ;;  %v2887_v49 = vcombine.high %v2543_v52, %v2543_v52  ;;  %v2799_v23 = vrot.slane %v2771_v46, %v4858_v3 }
 0x8ae   :  { %3177 = vst.sshfl [vmem:[%s5115_s7 + $0xb] sm:$0x1 pattern:$0x73625140] %v2770_v13  ;;  %v2801_v57 = vcombine.high %v2785_v8, %v2785_v8  ;;  %v2705_v0 = vcombine.high %v2703_v58, %v2703_v58  ;;  %v2719_v9 = vrot.slane %v2703_v58, %v4858_v3  ;;  %v2802_v53 = vcombine.high %v2792_v50, %v2792_v50 }
 0x8af   :  { %3179 = vst.sshfl [vmem:[%s5115_s7 + $0x2b] sm:$0x1 pattern:$0x73625140] %v2771_v46  ;;  %2814 = vst [vmem:[%s5115_s7 + $0x13] sm:$0x1] %v2800_v48  ;;  %v2726_v17 = vrot.slane %v2704_v32, %v4858_v3  ;;  %v2734_v27 = vcombine.high %v2712_v14, %v2712_v14  ;;  %v2894_v24 = vrot.slane %v2543_v52, %v4858_v3 }
 0x8b0   :  { %3173 = vst.sshfl [vmem:[%s5115_s7 + $0xa] sm:$0x1 pattern:$0x73625140] %v2704_v32  ;;  %v2803_v40 = vcombine.high %v2799_v23, %v2799_v23  ;;  %2818 = vst [vmem:[%s5115_s7 + $0x33] sm:$0x1] %v2801_v57  ;;  %v2733_v5 = vrot.slane %v2705_v0, %v4858_v3  ;;  %v2735_v60 = vcombine.high %v2719_v9, %v2719_v9 }
 0x8b1   :  { %3174 = vst.sshfl [vmem:[%s5115_s7 + $0x22] sm:$0x1 pattern:$0x73625140] %v2703_v58  ;;  %v2901_v16 = vrot.slane %v2887_v49, %v4858_v3  ;;  %2815 = vst [vmem:[%s5115_s7 + $0x1b] sm:$0x1] %v2802_v53  ;;  %v2736_v39 = vcombine.high %v2726_v17, %v2726_v17  ;;  %v2902_v37 = vcombine.high %v2894_v24, %v2894_v24 }
 0x8b2   :  { %3175 = vst.sshfl [vmem:[%s5115_s7 + $0x2a] sm:$0x1 pattern:$0x73625140] %v2705_v0  ;;  %2748 = vst [vmem:[%s5115_s7 + $0x12] sm:$0x1] %v2734_v27  ;;  %v2910_v43 = vrot.slane %v2894_v24, %v4858_v3  ;;  %v2538_v30 = vadd.f32 %v4855_v15, %v2537_v29  ;;  %v2737_v34 = vcombine.high %v2733_v5, %v2733_v5 }
 0x8b3   :  { %3184 = vst.sshfl [vmem:[%s5115_s7 + $0x5] sm:$0x1 pattern:$0x73625140] %v2894_v24  ;;  %2819 = vst [vmem:[%s5115_s7 + $0x3b] sm:$0x1] %v2803_v40  ;;  %v2903_v41 = vcombine.high %v2901_v16, %v2901_v16  ;;  %v2917_v59 = vrot.slane %v2901_v16, %v4858_v3  ;;  %v2417_v22 = vmul.f32 %v4028_v7, %v4026_v10 }
 0x8b4   :  { %2752 = vst [vmem:[%s5115_s7 + $0x32] sm:$0x1] %v2735_v60  ;;  %3186 = vst.sshfl [vmem:[%s5115_s7 + $0x25] sm:$0x1 pattern:$0x73625140] %v2901_v16  ;;  %v2924_v38 = vrot.slane %v2902_v37, %v4858_v3  ;;  %v2932_v63 = vcombine.high %v2910_v43, %v2910_v43  ;;  %v2821_v1 = vcombine.high %v2538_v30, %v2538_v30 }
 0x8b5   :  { %2749 = vst [vmem:[%s5115_s7 + $0x1a] sm:$0x1] %v2736_v39  ;;  %3185 = vst.sshfl [vmem:[%s5115_s7 + $0xd] sm:$0x1 pattern:$0x73625140] %v2902_v37  ;;  %v2828_v33 = vrot.slane %v2538_v30, %v4858_v3  ;;  %v2931_v44 = vrot.slane %v2903_v41, %v4858_v3  ;;  %v2933_v45 = vcombine.high %v2917_v59, %v2917_v59  ;;  %3262 = vmatmul.mubr.f32.gmra.mrb[22].mxu0 %v2417_v22 }
 0x8b6   :  { %2753 = vst [vmem:[%s5115_s7 + $0x3a] sm:$0x1] %v2737_v34  ;;  %3187 = vst.sshfl [vmem:[%s5115_s7 + $0x2d] sm:$0x1 pattern:$0x73625140] %v2903_v41  ;;  %v2934_v61 = vcombine.high %v2924_v38, %v2924_v38  ;;  %v2835_v11 = vrot.slane %v2821_v1, %v4858_v3 }
 0x8b7   :  { %2946 = vst [vmem:[%s5115_s7 + $0x15] sm:$0x1] %v2932_v63  ;;  %v2836_v18 = vcombine.high %v2828_v33, %v2828_v33  ;;  %v2844_v20 = vrot.slane %v2828_v33, %v4858_v3  ;;  %3180 = vst.sshfl [vmem:[%s5115_s7 + $0x4] sm:$0x1 pattern:$0x73625140] %v2828_v33  ;;  %v2935_v35 = vcombine.high %v2931_v44, %v2931_v44 }
 0x8b8   :  { %2950 = vst [vmem:[%s5115_s7 + $0x35] sm:$0x1] %v2933_v45  ;;  %2947 = vst [vmem:[%s5115_s7 + $0x1d] sm:$0x1] %v2934_v61  ;;  %v2837_v21 = vcombine.high %v2835_v11, %v2835_v11  ;;  %v2851_v26 = vrot.slane %v2835_v11, %v4858_v3 }
 0x8b9   :  { %v2858_v36 = vrot.slane %v2836_v18, %v4858_v3  ;;  %v2866_v42 = vcombine.high %v2844_v20, %v2844_v20  ;;  %3181 = vst.sshfl [vmem:[%s5115_s7 + $0xc] sm:$0x1 pattern:$0x73625140] %v2836_v18  ;;  %2951 = vst [vmem:[%s5115_s7 + $0x3d] sm:$0x1] %v2935_v35 }
 0x8ba   :  { %3182 = vst.sshfl [vmem:[%s5115_s7 + $0x24] sm:$0x1 pattern:$0x73625140] %v2835_v11  ;;  %v2865_v51 = vrot.slane %v2837_v21, %v4858_v3  ;;  %v2867_v47 = vcombine.high %v2851_v26, %v2851_v26 }
 0x8bb   :  { %v2868_v4 = vcombine.high %v2858_v36, %v2858_v36  ;;  %2880 = vst [vmem:[%s5115_s7 + $0x14] sm:$0x1] %v2866_v42  ;;  %3183 = vst.sshfl [vmem:[%s5115_s7 + $0x2c] sm:$0x1 pattern:$0x73625140] %v2837_v21 }
 0x8bc   :  { %v2869_v6 = vcombine.high %v2865_v51, %v2865_v51  ;;  %2884 = vst [vmem:[%s5115_s7 + $0x34] sm:$0x1] %v2867_v47 }
 0x8bd   :  { %2881 = vst [vmem:[%s5115_s7 + $0x1c] sm:$0x1] %v2868_v4 }
 0x8be   :  { %2885 = vst [vmem:[%s5115_s7 + $0x3c] sm:$0x1] %v2869_v6 }
 0x988   :  { %v3263_v29 = vpop.f32.mrb[22].mxu0 }
 0x989   :  { %v2553_v55 = vadd.f32 %v3263_v29, %v4855_v15  ;;  %v2547_v31 = vpop.f32.mrb[23].mxu0 }
 0x98a   :  { %v2548_v56 = vadd.f32 %v4855_v15, %v2547_v31 }
 0x98b   :  { %v3019_v54 = vcombine.high %v2553_v55, %v2553_v55  ;;  %v3026_v62 = vrot.slane %v2553_v55, %v4858_v3 }
 0x98c   :  { %v2953_v2 = vcombine.high %v2548_v56, %v2548_v56  ;;  %v2960_v12 = vrot.slane %v2548_v56, %v4858_v3 }
 0x98d   :  { %v3033_v19 = vrot.slane %v3019_v54, %v4858_v3  ;;  %v3034_v28 = vcombine.high %v3026_v62, %v3026_v62  ;;  %v3042_v13 = vrot.slane %v3026_v62, %v4858_v3  ;;  %3192 = vst.sshfl [vmem:[%s5115_s7 + $0x7] sm:$0x1 pattern:$0x73625140] %v3026_v62 }
 0x98e   :  { %v2967_v25 = vrot.slane %v2953_v2, %v4858_v3  ;;  %v2968_v52 = vcombine.high %v2960_v12, %v2960_v12  ;;  %v2976_v15 = vrot.slane %v2960_v12, %v4858_v3  ;;  %3188 = vst.sshfl [vmem:[%s5115_s7 + $0x6] sm:$0x1 pattern:$0x73625140] %v2960_v12 }
 0x98f   :  { %v3035_v10 = vcombine.high %v3033_v19, %v3033_v19  ;;  %v3049_v46 = vrot.slane %v3033_v19, %v4858_v3  ;;  %v3056_v8 = vrot.slane %v3034_v28, %v4858_v3  ;;  %v3064_v58 = vcombine.high %v3042_v13, %v3042_v13  ;;  %3193 = vst.sshfl [vmem:[%s5115_s7 + $0xf] sm:$0x1 pattern:$0x73625140] %v3034_v28 }
 0x990   :  { %3194 = vst.sshfl [vmem:[%s5115_s7 + $0x27] sm:$0x1 pattern:$0x73625140] %v3033_v19  ;;  %v2969_v32 = vcombine.high %v2967_v25, %v2967_v25  ;;  %v2983_v7 = vrot.slane %v2967_v25, %v4858_v3  ;;  %v2990_v50 = vrot.slane %v2968_v52, %v4858_v3  ;;  %v2998_v48 = vcombine.high %v2976_v15, %v2976_v15 }
 0x991   :  { %3189 = vst.sshfl [vmem:[%s5115_s7 + $0xe] sm:$0x1 pattern:$0x73625140] %v2968_v52  ;;  %v3063_v14 = vrot.slane %v3035_v10, %v4858_v3  ;;  %v3065_v49 = vcombine.high %v3049_v46, %v3049_v46  ;;  %v3066_v23 = vcombine.high %v3056_v8, %v3056_v8  ;;  %3078 = vst [vmem:[%s5115_s7 + $0x17] sm:$0x1] %v3064_v58 }
 0x992   :  { %3190 = vst.sshfl [vmem:[%s5115_s7 + $0x26] sm:$0x1 pattern:$0x73625140] %v2967_v25  ;;  %v2997_v57 = vrot.slane %v2969_v32, %v4858_v3  ;;  %v2999_v0 = vcombine.high %v2983_v7, %v2983_v7  ;;  %v3000_v9 = vcombine.high %v2990_v50, %v2990_v50  ;;  %3012 = vst [vmem:[%s5115_s7 + $0x16] sm:$0x1] %v2998_v48 }
 0x993   :  { %3195 = vst.sshfl [vmem:[%s5115_s7 + $0x2f] sm:$0x1 pattern:$0x73625140] %v3035_v10  ;;  %v3067_v53 = vcombine.high %v3063_v14, %v3063_v14  ;;  %3079 = vst [vmem:[%s5115_s7 + $0x1f] sm:$0x1] %v3066_v23 }
 0x994   :  { %3191 = vst.sshfl [vmem:[%s5115_s7 + $0x2e] sm:$0x1 pattern:$0x73625140] %v2969_v32  ;;  %3082 = vst [vmem:[%s5115_s7 + $0x37] sm:$0x1] %v3065_v49  ;;  %v3001_v3 = vcombine.high %v2997_v57, %v2997_v57 }
 0x995   :  { %3013 = vst [vmem:[%s5115_s7 + $0x1e] sm:$0x1] %v3000_v9  ;;  %3016 = vst [vmem:[%s5115_s7 + $0x36] sm:$0x1] %v2999_v0 }
 0x996   :  { %3083 = vst [vmem:[%s5115_s7 + $0x3f] sm:$0x1] %v3067_v53  ;;  %3017 = vst [vmem:[%s5115_s7 + $0x3e] sm:$0x1] %v3001_v3 }
 0x997   :  { %3088 = vsyncpa [#allocation6], 1 }
 0x998   :  { %3089 = vsyncpa [#allocation10], 1 }
 0x999   :  { %3090 = vsyncpa [#allocation13], 1 }
 0x99a   :  { %3091 = vsyncpa [#allocation7], 1 }

</bundles_post_ra>
